<compile_context>
chip_gen: v7x
topology: tpu7x:2x2x1
jax: 0.10.0
libtpu: 0.0.40
codegen_flags: <defaults>
</compile_context>

<pallas_src>
import jax
import jax.numpy as jnp
from jax.experimental import pallas as pl
from jax.experimental.pallas import tpu as pltpu

BT_DEFAULT = 16   # images per grid step (M target: ~128 v5e -> BT 8, ~256 v6e/v7x -> BT 16-32)


# ----------------------------- fused Pallas kernel -------------------------- #

def _mynn_kernel(x_ref, t1_ref, t2_ref, b1_ref, b2_ref, w1_ref, fb1_ref,
                 w2_ref, fb2_ref, o_ref, y1_scr):
    """One batch tile (BT images) per grid step.

    Per-block shapes (bt = BT):
      x_ref  : [1, 24*bt, 140] bf16  im2col'd image rows, M = (dy, ph, b),
                                     K = kh*28 + w
      t1_ref : [140, 256] bf16  conv1 pooled-Toeplitz, N = dx0(128) | dx1(128)
      t2_ref : [5, 128, 256] bf16  conv2 pooled-Toeplitz per kh
      b1_ref : [1, 128] f32   conv1 bias tiled over pooled width (pad 0)
      b2_ref : [1, 128] f32   conv2 bias tiled over pooled width (pad 0)
      w1_ref : [4, 128, 128] bf16  fc1 weight regrouped per pooled conv2 row
      fb1_ref: [1, 128] f32   w2_ref: [128, 128] bf16   fb2_ref: [1, 128] f32
      o_ref  : [bt, 128] f32  lane-dense log-softmax slab (lanes 0..9 valid)
      y1_scr : VMEM [12*bt, 128] bf16  pooled conv1 activation,
               rows = h*bt + b, lanes = pw*10 + ci (120 used, 8 pad)
    """
    f32 = jnp.float32
    bf16 = jnp.bfloat16
    bt = o_ref.shape[0]

    # ---- conv1 (1->10, k=5) + full 2x2 max-pool + bias + relu --------------
    lhs = x_ref[0]                                                  # [24bt, 140]
    c = jnp.dot(lhs, t1_ref[...], preferred_element_type=f32)      # [24bt, 256]
    c = jnp.maximum(c[:12 * bt, :], c[12 * bt:, :])                # pool over dy
    y1 = jnp.maximum(c[:, :128], c[:, 128:])                       # pool over dx
    y1_scr[...] = jnp.maximum(y1 + b1_ref[...], 0.0).astype(bf16)  # [12bt, 128]

    # ---- conv2 (10->20, k=5) + width half of the 2x2 pool -------------------
    # (Dropout2d in eval mode == identity.)
    acc = jnp.zeros((8 * bt, 256), f32)
    for kh in range(5):
        acc = acc + jnp.dot(y1_scr[kh * bt:(kh + 8) * bt, :], t2_ref[kh],
                            preferred_element_type=f32)
    z = jnp.maximum(acc[:, :128], acc[:, 128:])                    # [8bt, 128]

    # ---- height half of conv2 pool + bias + relu + fc1 (per pooled row) -----
    h = fb1_ref[...] + jnp.zeros((bt, 128), f32)
    for p in range(4):
        zp = jnp.maximum(z[(2 * p) * bt:(2 * p + 1) * bt, :],
                         z[(2 * p + 1) * bt:(2 * p + 2) * bt, :])  # [bt, 128]
        zp = jnp.maximum(zp + b2_ref[...], 0.0)
        h = h + jnp.dot(zp.astype(bf16), w1_ref[p], preferred_element_type=f32)
    h = jnp.maximum(h, 0.0)                                        # (eval dropout = id)

    # ---- fc2 + numerically-stable log_softmax --------------------------------
    # Padded logit lanes carry a -1e30 bias -> exp() == 0, so the 128-lane
    # reduction equals the 10-lane one.
    logits = (jnp.dot(h.astype(bf16), w2_ref[...], preferred_element_type=f32)
              + fb2_ref[...])
    m = jnp.max(logits, axis=-1, keepdims=True)
    zz = logits - m
    lse = jnp.log(jnp.sum(jnp.exp(zz), axis=-1, keepdims=True))
    o_ref[...] = (zz - lse).astype(o_ref.dtype)


# ------------------------- host-side weight restaging ------------------------ #

def _pooled_toeplitz(w, n_in, n_pool):
    """w: torch-layout conv weight [Cout, Cin, KH, KW].

    Returns T of shape [2, KH, n_in*Cin, n_pool*Cout] with
      T[dx, kh, w_in*Cin + ci, pw*Cout + co] = w[co, ci, kh, w_in - (2*pw + dx)]
    (zero when the kw index falls outside [0, KW)).  An input row with lane
    layout (w_in, ci) times T[dx, kh] gives the conv response at output columns
    2*pw + dx, i.e. the width-pooling taps.
    """
    Cout, Cin, KH, KW = w.shape
    w_in = jnp.arange(n_in)
    pw = jnp.arange(n_pool)
    per_dx = []
    for dx in range(2):
        per_kh = []
        for kh in range(KH):
            kw_idx = w_in[:, None] - 2 * pw[None, :] - dx             # [n_in, n_pool]
            valid = (kw_idx >= 0) & (kw_idx < KW)
            wk = jnp.transpose(w[:, :, kh, :], (2, 1, 0))             # [KW, Cin, Cout]
            vals = wk[jnp.clip(kw_idx, 0, KW - 1)]                    # [n_in, n_pool, Cin, Cout]
            vals = jnp.where(valid[:, :, None, None], vals, 0.0)
            vals = jnp.transpose(vals, (0, 2, 1, 3))                  # [n_in, Cin, n_pool, Cout]
            per_kh.append(vals.reshape(n_in * Cin, n_pool * Cout))
        per_dx.append(jnp.stack(per_kh))
    return jnp.stack(per_dx)                                          # [2, KH, ., .]


def prepare_params(params):
    """One-time restaging of torch-layout weights into kernel-ready bf16 tiles."""
    bf16 = jnp.bfloat16
    f32 = jnp.float32

    # conv1: fold kh into K (140), concat dx halves along N, pad each to 128.
    t1 = _pooled_toeplitz(params["conv1_w"], 28, 12)                 # [2, 5, 28, 120]
    t1 = t1.reshape(2, 140, 120)
    t1 = jnp.pad(t1, ((0, 0), (0, 0), (0, 8)))                       # [2, 140, 128]
    t1 = jnp.concatenate([t1[0], t1[1]], axis=-1)                    # [140, 256]

    # conv2: per-kh matrices, K padded 120->128, dx halves concat along N.
    t2 = _pooled_toeplitz(params["conv2_w"], 12, 4)                  # [2, 5, 120, 80]
    t2 = jnp.pad(t2, ((0, 0), (0, 0), (0, 8), (0, 48)))              # [2, 5, 128, 128]
    t2 = jnp.concatenate([t2[0], t2[1]], axis=-1)                    # [5, 128, 256]

    b1 = jnp.pad(jnp.tile(params["conv1_b"], 12), (0, 8))[None, :]   # [1, 128]
    b2 = jnp.pad(jnp.tile(params["conv2_b"], 4), (0, 48))[None, :]   # [1, 128]

    # PyTorch flatten index is c*16 + h*4 + w; regroup fc1_w to [h, w*20+c, 50]
    # so the flatten is consumed row-by-row with no runtime transpose.
    w1 = jnp.transpose(params["fc1_w"].reshape(50, 20, 4, 4),
                       (2, 3, 1, 0)).reshape(4, 80, 50)
    w1 = jnp.pad(w1, ((0, 0), (0, 48), (0, 78)))                     # [4, 128, 128]
    fb1 = jnp.pad(params["fc1_b"], (0, 78))[None, :]                 # [1, 128]

    w2 = jnp.pad(params["fc2_w"].T, ((0, 78), (0, 118)))             # [128, 128]
    fb2 = jnp.pad(params["fc2_b"], (0, 118),
                  constant_values=-1e30)[None, :]                    # [1, 128]

    return {
        "t1": t1.astype(bf16), "t2": t2.astype(bf16),
        "b1": b1.astype(f32), "b2": b2.astype(f32),
        "w1": w1.astype(bf16), "fb1": fb1.astype(f32),
        "w2": w2.astype(bf16), "fb2": fb2.astype(f32),
    }


# ------------------------------ model forward -------------------------------- #

def mynn_forward(x_nchw, prepared, *, block_batch=BT_DEFAULT):
    """Equivalent of Mynn.forward (inference mode).  x: [B, 1, 28, 28] f32."""
    B = x_nchw.shape[0]
    assert x_nchw.shape[1:] == (1, 28, 28)
    bt = block_batch
    n_tiles = (B + bt - 1) // bt
    Bp = n_tiles * bt

    x = x_nchw[:, 0]                                                 # [B, 28, 28]
    if Bp != B:
        x = jnp.pad(x, ((0, Bp - B), (0, 0), (0, 0)))

    # im2col for conv1: rows ordered (tile, dy, ph, b), lanes kh*28 + w.
    row_idx = (2 * jnp.arange(12)[None, :, None]
               + jnp.arange(2)[:, None, None]
               + jnp.arange(5)[None, None, :])                       # [2, 12, 5]
    g = x[:, row_idx, :]                                             # [Bp, 2, 12, 5, 28]
    g = g.reshape(Bp, 2, 12, 140)
    g = jnp.transpose(g, (1, 2, 0, 3))                               # [2, 12, Bp, 140]
    g = g.reshape(2, 12, n_tiles, bt, 140)
    g = jnp.transpose(g, (2, 0, 1, 3, 4))                            # [nt, 2, 12, bt, 140]
    x_cols = g.reshape(n_tiles, 24 * bt, 140).astype(jnp.bfloat16)

    out = pl.pallas_call(
        _mynn_kernel,
        grid=(n_tiles,),
        in_specs=[
            pl.BlockSpec((1, 24 * bt, 140), lambda i: (i, 0, 0)),    # per batch tile
            pl.BlockSpec((140, 256), lambda i: (0, 0)),              # VMEM-resident
            pl.BlockSpec((5, 128, 256), lambda i: (0, 0, 0)),
            pl.BlockSpec((1, 128), lambda i: (0, 0)),
            pl.BlockSpec((1, 128), lambda i: (0, 0)),
            pl.BlockSpec((4, 128, 128), lambda i: (0, 0, 0)),
            pl.BlockSpec((1, 128), lambda i: (0, 0)),
            pl.BlockSpec((128, 128), lambda i: (0, 0)),
            pl.BlockSpec((1, 128), lambda i: (0, 0)),
        ],
        out_specs=pl.BlockSpec((bt, 128), lambda i: (i, 0)),
        out_shape=jax.ShapeDtypeStruct((Bp, 128), jnp.float32),
        scratch_shapes=[pltpu.VMEM((12 * bt, 128), jnp.bfloat16)],
        compiler_params=pltpu.CompilerParams(
            dimension_semantics=("parallel",)),
    )(x_cols, prepared["t1"], prepared["t2"], prepared["b1"], prepared["b2"],
      prepared["w1"], prepared["fb1"], prepared["w2"], prepared["fb2"])
    return out[:B, :10]                                              # [B, 10]


# ----------------------------- pure-JAX reference ---------------------------- #

def reference_forward(x_nchw, params):
    x = jnp.transpose(x_nchw, (0, 2, 3, 1))

    def conv(x, w_t, b):
        w = jnp.transpose(w_t, (2, 3, 1, 0))                         # OIHW -> HWIO
        y = jax.lax.conv_general_dilated(
            x, w, (1, 1), "VALID",
            dimension_numbers=("NHWC", "HWIO", "NHWC"))
        return y + b

    def pool_relu(y):
        p = jax.lax.reduce_window(y, -jnp.inf, jax.lax.max,
                                  (1, 2, 2, 1), (1, 2, 2, 1), "VALID")
        return jax.nn.relu(p)

    y = pool_relu(conv(x, params["conv1_w"], params["conv1_b"]))
    z = pool_relu(conv(y, params["conv2_w"], params["conv2_b"]))
    flat = jnp.transpose(z, (0, 3, 1, 2)).reshape(z.shape[0], -1)
    h = jax.nn.relu(flat @ params["fc1_w"].T + params["fc1_b"])
    logits = h @ params["fc2_w"].T + params["fc2_b"]
    return jax.nn.log_softmax(logits, axis=1)


# ---------------------------------- params ----------------------------------- #

def init_params(key):
    ks = jax.random.split(key, 8)

    def init(k, shape, fan_in):
        bound = 1.0 / jnp.sqrt(jnp.float32(fan_in))
        return jax.random.uniform(k, shape, jnp.float32, -bound, bound)

    return {
        "conv1_w": init(ks[0], (10, 1, 5, 5), 25),     # torch OIHW
        "conv1_b": init(ks[1], (10,), 25),
        "conv2_w": init(ks[2], (20, 10, 5, 5), 250),
        "conv2_b": init(ks[3], (20,), 250),
        "fc1_w":  init(ks[4], (50, 320), 320),         # torch [out, in]
        "fc1_b":  init(ks[5], (50,), 320),
        "fc2_w":  init(ks[6], (10, 50), 50),
        "fc2_b":  init(ks[7], (10,), 50),
    }


if __name__ == "__main__":
    key = jax.random.PRNGKey(0)
    pkey, xkey = jax.random.split(key)
    params = init_params(pkey)
    prepared = prepare_params(params)          # one-time weight restaging (hoisted)

    # 32 MNIST-sized images -> 2 batch tiles of 16 (both v7x TCs used).
    x = jax.random.normal(xkey, (32, 1, 28, 28), jnp.float32)

    out = jax.jit(mynn_forward)(x, prepared)
    out = jax.block_until_ready(out)
    ref = reference_forward(x, params)
    assert out.shape == (32, 10)
    err = float(jnp.max(jnp.abs(out - ref)))
    assert err < 5e-2, f"max|err|={err}"       # bf16 operands vs f32 reference

    # Ragged batch exercises the batch-padding path.
    out_small = jax.block_until_ready(jax.jit(mynn_forward)(x[:5], prepared))
    err_small = float(jnp.max(jnp.abs(out_small - ref[:5])))
    assert out_small.shape == (5, 10)
    assert err_small < 5e-2, f"max|err|={err_small}"

    print("KERNEL_OK")
</pallas_src>

<mosaic_0001>
module attributes {stable_mosaic.version = 11 : i64} {
  func.func @_mynn_kernel(%arg0: i32, %arg1: memref<1x384x140xbf16, #tpu.memory_space<vmem>>, %arg2: memref<140x256xbf16, #tpu.memory_space<vmem>>, %arg3: memref<5x128x256xbf16, #tpu.memory_space<vmem>>, %arg4: memref<1x128xf32, #tpu.memory_space<vmem>>, %arg5: memref<1x128xf32, #tpu.memory_space<vmem>>, %arg6: memref<4x128x128xbf16, #tpu.memory_space<vmem>>, %arg7: memref<1x128xf32, #tpu.memory_space<vmem>>, %arg8: memref<128x128xbf16, #tpu.memory_space<vmem>>, %arg9: memref<1x128xf32, #tpu.memory_space<vmem>>, %arg10: memref<16x128xf32, #tpu.memory_space<vmem>>, %arg11: memref<192x128xbf16, #tpu.memory_space<vmem>>) attributes {dimension_semantics = [#tpu.dimension_semantics<parallel>], iteration_bounds = array<i64: 2>, scalar_prefetch = 0 : i64, scratch_operands = 1 : i64, tpu.core_type = #tpu.core_type<tc>, window_params = [{transform_indices = @transform_0, window_bounds = array<i64: 1, 384, 140>}, {pipeline_mode = #tpu.pipeline_mode<synchronous>, transform_indices = @transform_1, window_bounds = array<i64: 140, 256>}, {pipeline_mode = #tpu.pipeline_mode<synchronous>, transform_indices = @transform_2, window_bounds = array<i64: 5, 128, 256>}, {pipeline_mode = #tpu.pipeline_mode<synchronous>, transform_indices = @transform_3, window_bounds = array<i64: 1, 128>}, {pipeline_mode = #tpu.pipeline_mode<synchronous>, transform_indices = @transform_4, window_bounds = array<i64: 1, 128>}, {pipeline_mode = #tpu.pipeline_mode<synchronous>, transform_indices = @transform_5, window_bounds = array<i64: 4, 128, 128>}, {pipeline_mode = #tpu.pipeline_mode<synchronous>, transform_indices = @transform_6, window_bounds = array<i64: 1, 128>}, {pipeline_mode = #tpu.pipeline_mode<synchronous>, transform_indices = @transform_7, window_bounds = array<i64: 128, 128>}, {pipeline_mode = #tpu.pipeline_mode<synchronous>, transform_indices = @transform_8, window_bounds = array<i64: 1, 128>}, {transform_indices = @transform_9, window_bounds = array<i64: 16, 128>}]} {
    %c0 = arith.constant 0 : index
    %c0_0 = arith.constant 0 : index
    %c0_1 = arith.constant 0 : index
    %0 = vector.load %arg1[%c0, %c0_0, %c0_1] : memref<1x384x140xbf16, #tpu.memory_space<vmem>>, vector<1x384x140xbf16>
    %1 = vector.shape_cast %0 : vector<1x384x140xbf16> to vector<384x140xbf16>
    %c0_2 = arith.constant 0 : index
    %c0_3 = arith.constant 0 : index
    %2 = vector.load %arg2[%c0_2, %c0_3] : memref<140x256xbf16, #tpu.memory_space<vmem>>, vector<140x256xbf16>
    %cst = arith.constant dense<0.000000e+00> : vector<384x256xf32>
    %3 = tpu.matmul %1, %2, %cst {dimension_numbers = #tpu.dot_dimension_numbers<[1], [0], [0], [1], [0, 0, 1, 1], [], []>} : vector<384x140xbf16>, vector<140x256xbf16>, vector<384x256xf32> -> vector<384x256xf32>
    %4 = vector.extract_strided_slice %3 {offsets = [0, 0], sizes = [192, 256], strides = [1, 1]} : vector<384x256xf32> to vector<192x256xf32>
    %5 = vector.extract_strided_slice %3 {offsets = [192, 0], sizes = [192, 256], strides = [1, 1]} : vector<384x256xf32> to vector<192x256xf32>
    %6 = arith.maximumf %4, %5 : vector<192x256xf32>
    %7 = vector.extract_strided_slice %6 {offsets = [0, 0], sizes = [192, 128], strides = [1, 1]} : vector<192x256xf32> to vector<192x128xf32>
    %8 = vector.extract_strided_slice %6 {offsets = [0, 128], sizes = [192, 128], strides = [1, 1]} : vector<192x256xf32> to vector<192x128xf32>
    %9 = arith.maximumf %7, %8 : vector<192x128xf32>
    %c0_4 = arith.constant 0 : index
    %c0_5 = arith.constant 0 : index
    %10 = vector.load %arg4[%c0_4, %c0_5] : memref<1x128xf32, #tpu.memory_space<vmem>>, vector<1x128xf32>
    %11 = vector.broadcast %10 : vector<1x128xf32> to vector<192x128xf32>
    %12 = arith.addf %9, %11 : vector<192x128xf32>
    %cst_6 = arith.constant 0.000000e+00 : f32
    %13 = vector.broadcast %cst_6 : f32 to vector<192x128xf32>
    %14 = arith.maximumf %12, %13 : vector<192x128xf32>
    %15 = arith.truncf %14 : vector<192x128xf32> to vector<192x128xbf16>
    %c0_7 = arith.constant 0 : index
    %c0_8 = arith.constant 0 : index
    %16 = vector.load %arg11[%c0_7, %c0_8] : memref<192x128xbf16, #tpu.memory_space<vmem>>, vector<192x128xbf16>
    tpu.vector_store %arg11[%c0_7, %c0_8], %15 {strides = array<i32>} : memref<192x128xbf16, #tpu.memory_space<vmem>>, vector<192x128xbf16>,
    %cst_9 = arith.constant 0.000000e+00 : f32
    %17 = vector.broadcast %cst_9 : f32 to vector<128x256xf32>
    %c0_10 = arith.constant 0 : index
    %c0_11 = arith.constant 0 : index
    %18 = vector.load %arg11[%c0_10, %c0_11] : memref<192x128xbf16, #tpu.memory_space<vmem>>, vector<128x128xbf16>
    %c0_12 = arith.constant 0 : index
    %c0_13 = arith.constant 0 : index
    %c0_14 = arith.constant 0 : index
    %19 = vector.load %arg3[%c0_12, %c0_13, %c0_14] : memref<5x128x256xbf16, #tpu.memory_space<vmem>>, vector<1x128x256xbf16>
    %20 = vector.shape_cast %19 : vector<1x128x256xbf16> to vector<128x256xbf16>
    %cst_15 = arith.constant dense<0.000000e+00> : vector<128x256xf32>
    %21 = tpu.matmul %18, %20, %cst_15 {dimension_numbers = #tpu.dot_dimension_numbers<[1], [0], [0], [1], [0, 0, 1, 1], [], []>} : vector<128x128xbf16>, vector<128x256xbf16>, vector<128x256xf32> -> vector<128x256xf32>
    %22 = arith.addf %17, %21 : vector<128x256xf32>
    %c16 = arith.constant 16 : index
    %c0_16 = arith.constant 0 : index
    %23 = vector.load %arg11[%c16, %c0_16] : memref<192x128xbf16, #tpu.memory_space<vmem>>, vector<128x128xbf16>
    %c1 = arith.constant 1 : index
    %c0_17 = arith.constant 0 : index
    %c0_18 = arith.constant 0 : index
    %24 = vector.load %arg3[%c1, %c0_17, %c0_18] : memref<5x128x256xbf16, #tpu.memory_space<vmem>>, vector<1x128x256xbf16>
    %25 = vector.shape_cast %24 : vector<1x128x256xbf16> to vector<128x256xbf16>
    %cst_19 = arith.constant dense<0.000000e+00> : vector<128x256xf32>
    %26 = tpu.matmul %23, %25, %cst_19 {dimension_numbers = #tpu.dot_dimension_numbers<[1], [0], [0], [1], [0, 0, 1, 1], [], []>} : vector<128x128xbf16>, vector<128x256xbf16>, vector<128x256xf32> -> vector<128x256xf32>
    %27 = arith.addf %22, %26 : vector<128x256xf32>
    %c32 = arith.constant 32 : index
    %c0_20 = arith.constant 0 : index
    %28 = vector.load %arg11[%c32, %c0_20] : memref<192x128xbf16, #tpu.memory_space<vmem>>, vector<128x128xbf16>
    %c2 = arith.constant 2 : index
    %c0_21 = arith.constant 0 : index
    %c0_22 = arith.constant 0 : index
    %29 = vector.load %arg3[%c2, %c0_21, %c0_22] : memref<5x128x256xbf16, #tpu.memory_space<vmem>>, vector<1x128x256xbf16>
    %30 = vector.shape_cast %29 : vector<1x128x256xbf16> to vector<128x256xbf16>
    %cst_23 = arith.constant dense<0.000000e+00> : vector<128x256xf32>
    %31 = tpu.matmul %28, %30, %cst_23 {dimension_numbers = #tpu.dot_dimension_numbers<[1], [0], [0], [1], [0, 0, 1, 1], [], []>} : vector<128x128xbf16>, vector<128x256xbf16>, vector<128x256xf32> -> vector<128x256xf32>
    %32 = arith.addf %27, %31 : vector<128x256xf32>
    %c48 = arith.constant 48 : index
    %c0_24 = arith.constant 0 : index
    %33 = vector.load %arg11[%c48, %c0_24] : memref<192x128xbf16, #tpu.memory_space<vmem>>, vector<128x128xbf16>
    %c3 = arith.constant 3 : index
    %c0_25 = arith.constant 0 : index
    %c0_26 = arith.constant 0 : index
    %34 = vector.load %arg3[%c3, %c0_25, %c0_26] : memref<5x128x256xbf16, #tpu.memory_space<vmem>>, vector<1x128x256xbf16>
    %35 = vector.shape_cast %34 : vector<1x128x256xbf16> to vector<128x256xbf16>
    %cst_27 = arith.constant dense<0.000000e+00> : vector<128x256xf32>
    %36 = tpu.matmul %33, %35, %cst_27 {dimension_numbers = #tpu.dot_dimension_numbers<[1], [0], [0], [1], [0, 0, 1, 1], [], []>} : vector<128x128xbf16>, vector<128x256xbf16>, vector<128x256xf32> -> vector<128x256xf32>
    %37 = arith.addf %32, %36 : vector<128x256xf32>
    %c64 = arith.constant 64 : index
    %c0_28 = arith.constant 0 : index
    %38 = vector.load %arg11[%c64, %c0_28] : memref<192x128xbf16, #tpu.memory_space<vmem>>, vector<128x128xbf16>
    %c4 = arith.constant 4 : index
    %c0_29 = arith.constant 0 : index
    %c0_30 = arith.constant 0 : index
    %39 = vector.load %arg3[%c4, %c0_29, %c0_30] : memref<5x128x256xbf16, #tpu.memory_space<vmem>>, vector<1x128x256xbf16>
    %40 = vector.shape_cast %39 : vector<1x128x256xbf16> to vector<128x256xbf16>
    %cst_31 = arith.constant dense<0.000000e+00> : vector<128x256xf32>
    %41 = tpu.matmul %38, %40, %cst_31 {dimension_numbers = #tpu.dot_dimension_numbers<[1], [0], [0], [1], [0, 0, 1, 1], [], []>} : vector<128x128xbf16>, vector<128x256xbf16>, vector<128x256xf32> -> vector<128x256xf32>
    %42 = arith.addf %37, %41 : vector<128x256xf32>
    %43 = vector.extract_strided_slice %42 {offsets = [0, 0], sizes = [128, 128], strides = [1, 1]} : vector<128x256xf32> to vector<128x128xf32>
    %44 = vector.extract_strided_slice %42 {offsets = [0, 128], sizes = [128, 128], strides = [1, 1]} : vector<128x256xf32> to vector<128x128xf32>
    %45 = arith.maximumf %43, %44 : vector<128x128xf32>
    %c0_32 = arith.constant 0 : index
    %c0_33 = arith.constant 0 : index
    %46 = vector.load %arg7[%c0_32, %c0_33] : memref<1x128xf32, #tpu.memory_space<vmem>>, vector<1x128xf32>
    %cst_34 = arith.constant 0.000000e+00 : f32
    %47 = vector.broadcast %cst_34 : f32 to vector<16x128xf32>
    %48 = vector.broadcast %46 : vector<1x128xf32> to vector<16x128xf32>
    %49 = arith.addf %48, %47 : vector<16x128xf32>
    %50 = vector.extract_strided_slice %45 {offsets = [0, 0], sizes = [16, 128], strides = [1, 1]} : vector<128x128xf32> to vector<16x128xf32>
    %51 = vector.extract_strided_slice %45 {offsets = [16, 0], sizes = [16, 128], strides = [1, 1]} : vector<128x128xf32> to vector<16x128xf32>
    %52 = arith.maximumf %50, %51 : vector<16x128xf32>
    %c0_35 = arith.constant 0 : index
    %c0_36 = arith.constant 0 : index
    %53 = vector.load %arg5[%c0_35, %c0_36] : memref<1x128xf32, #tpu.memory_space<vmem>>, vector<1x128xf32>
    %54 = vector.broadcast %53 : vector<1x128xf32> to vector<16x128xf32>
    %55 = arith.addf %52, %54 : vector<16x128xf32>
    %cst_37 = arith.constant 0.000000e+00 : f32
    %56 = vector.broadcast %cst_37 : f32 to vector<16x128xf32>
    %57 = arith.maximumf %55, %56 : vector<16x128xf32>
    %58 = arith.truncf %57 : vector<16x128xf32> to vector<16x128xbf16>
    %c0_38 = arith.constant 0 : index
    %c0_39 = arith.constant 0 : index
    %c0_40 = arith.constant 0 : index
    %59 = vector.load %arg6[%c0_38, %c0_39, %c0_40] : memref<4x128x128xbf16, #tpu.memory_space<vmem>>, vector<1x128x128xbf16>
    %60 = vector.shape_cast %59 : vector<1x128x128xbf16> to vector<128x128xbf16>
    %cst_41 = arith.constant dense<0.000000e+00> : vector<16x128xf32>
    %61 = tpu.matmul %58, %60, %cst_41 {dimension_numbers = #tpu.dot_dimension_numbers<[1], [0], [0], [1], [0, 0, 1, 1], [], []>} : vector<16x128xbf16>, vector<128x128xbf16>, vector<16x128xf32> -> vector<16x128xf32>
    %62 = arith.addf %49, %61 : vector<16x128xf32>
    %63 = vector.extract_strided_slice %45 {offsets = [32, 0], sizes = [16, 128], strides = [1, 1]} : vector<128x128xf32> to vector<16x128xf32>
    %64 = vector.extract_strided_slice %45 {offsets = [48, 0], sizes = [16, 128], strides = [1, 1]} : vector<128x128xf32> to vector<16x128xf32>
    %65 = arith.maximumf %63, %64 : vector<16x128xf32>
    %c0_42 = arith.constant 0 : index
    %c0_43 = arith.constant 0 : index
    %66 = vector.load %arg5[%c0_42, %c0_43] : memref<1x128xf32, #tpu.memory_space<vmem>>, vector<1x128xf32>
    %67 = vector.broadcast %66 : vector<1x128xf32> to vector<16x128xf32>
    %68 = arith.addf %65, %67 : vector<16x128xf32>
    %cst_44 = arith.constant 0.000000e+00 : f32
    %69 = vector.broadcast %cst_44 : f32 to vector<16x128xf32>
    %70 = arith.maximumf %68, %69 : vector<16x128xf32>
    %71 = arith.truncf %70 : vector<16x128xf32> to vector<16x128xbf16>
    %c1_45 = arith.constant 1 : index
    %c0_46 = arith.constant 0 : index
    %c0_47 = arith.constant 0 : index
    %72 = vector.load %arg6[%c1_45, %c0_46, %c0_47] : memref<4x128x128xbf16, #tpu.memory_space<vmem>>, vector<1x128x128xbf16>
    %73 = vector.shape_cast %72 : vector<1x128x128xbf16> to vector<128x128xbf16>
    %cst_48 = arith.constant dense<0.000000e+00> : vector<16x128xf32>
    %74 = tpu.matmul %71, %73, %cst_48 {dimension_numbers = #tpu.dot_dimension_numbers<[1], [0], [0], [1], [0, 0, 1, 1], [], []>} : vector<16x128xbf16>, vector<128x128xbf16>, vector<16x128xf32> -> vector<16x128xf32>
    %75 = arith.addf %62, %74 : vector<16x128xf32>
    %76 = vector.extract_strided_slice %45 {offsets = [64, 0], sizes = [16, 128], strides = [1, 1]} : vector<128x128xf32> to vector<16x128xf32>
    %77 = vector.extract_strided_slice %45 {offsets = [80, 0], sizes = [16, 128], strides = [1, 1]} : vector<128x128xf32> to vector<16x128xf32>
    %78 = arith.maximumf %76, %77 : vector<16x128xf32>
    %c0_49 = arith.constant 0 : index
    %c0_50 = arith.constant 0 : index
    %79 = vector.load %arg5[%c0_49, %c0_50] : memref<1x128xf32, #tpu.memory_space<vmem>>, vector<1x128xf32>
    %80 = vector.broadcast %79 : vector<1x128xf32> to vector<16x128xf32>
    %81 = arith.addf %78, %80 : vector<16x128xf32>
    %cst_51 = arith.constant 0.000000e+00 : f32
    %82 = vector.broadcast %cst_51 : f32 to vector<16x128xf32>
    %83 = arith.maximumf %81, %82 : vector<16x128xf32>
    %84 = arith.truncf %83 : vector<16x128xf32> to vector<16x128xbf16>
    %c2_52 = arith.constant 2 : index
    %c0_53 = arith.constant 0 : index
    %c0_54 = arith.constant 0 : index
    %85 = vector.load %arg6[%c2_52, %c0_53, %c0_54] : memref<4x128x128xbf16, #tpu.memory_space<vmem>>, vector<1x128x128xbf16>
    %86 = vector.shape_cast %85 : vector<1x128x128xbf16> to vector<128x128xbf16>
    %cst_55 = arith.constant dense<0.000000e+00> : vector<16x128xf32>
    %87 = tpu.matmul %84, %86, %cst_55 {dimension_numbers = #tpu.dot_dimension_numbers<[1], [0], [0], [1], [0, 0, 1, 1], [], []>} : vector<16x128xbf16>, vector<128x128xbf16>, vector<16x128xf32> -> vector<16x128xf32>
    %88 = arith.addf %75, %87 : vector<16x128xf32>
    %89 = vector.extract_strided_slice %45 {offsets = [96, 0], sizes = [16, 128], strides = [1, 1]} : vector<128x128xf32> to vector<16x128xf32>
    %90 = vector.extract_strided_slice %45 {offsets = [112, 0], sizes = [16, 128], strides = [1, 1]} : vector<128x128xf32> to vector<16x128xf32>
    %91 = arith.maximumf %89, %90 : vector<16x128xf32>
    %c0_56 = arith.constant 0 : index
    %c0_57 = arith.constant 0 : index
    %92 = vector.load %arg5[%c0_56, %c0_57] : memref<1x128xf32, #tpu.memory_space<vmem>>, vector<1x128xf32>
    %93 = vector.broadcast %92 : vector<1x128xf32> to vector<16x128xf32>
    %94 = arith.addf %91, %93 : vector<16x128xf32>
    %cst_58 = arith.constant 0.000000e+00 : f32
    %95 = vector.broadcast %cst_58 : f32 to vector<16x128xf32>
    %96 = arith.maximumf %94, %95 : vector<16x128xf32>
    %97 = arith.truncf %96 : vector<16x128xf32> to vector<16x128xbf16>
    %c3_59 = arith.constant 3 : index
    %c0_60 = arith.constant 0 : index
    %c0_61 = arith.constant 0 : index
    %98 = vector.load %arg6[%c3_59, %c0_60, %c0_61] : memref<4x128x128xbf16, #tpu.memory_space<vmem>>, vector<1x128x128xbf16>
    %99 = vector.shape_cast %98 : vector<1x128x128xbf16> to vector<128x128xbf16>
    %cst_62 = arith.constant dense<0.000000e+00> : vector<16x128xf32>
    %100 = tpu.matmul %97, %99, %cst_62 {dimension_numbers = #tpu.dot_dimension_numbers<[1], [0], [0], [1], [0, 0, 1, 1], [], []>} : vector<16x128xbf16>, vector<128x128xbf16>, vector<16x128xf32> -> vector<16x128xf32>
    %101 = arith.addf %88, %100 : vector<16x128xf32>
    %cst_63 = arith.constant 0.000000e+00 : f32
    %102 = vector.broadcast %cst_63 : f32 to vector<16x128xf32>
    %103 = arith.maximumf %101, %102 : vector<16x128xf32>
    %104 = arith.truncf %103 : vector<16x128xf32> to vector<16x128xbf16>
    %c0_64 = arith.constant 0 : index
    %c0_65 = arith.constant 0 : index
    %105 = vector.load %arg8[%c0_64, %c0_65] : memref<128x128xbf16, #tpu.memory_space<vmem>>, vector<128x128xbf16>
    %cst_66 = arith.constant dense<0.000000e+00> : vector<16x128xf32>
    %106 = tpu.matmul %104, %105, %cst_66 {dimension_numbers = #tpu.dot_dimension_numbers<[1], [0], [0], [1], [0, 0, 1, 1], [], []>} : vector<16x128xbf16>, vector<128x128xbf16>, vector<16x128xf32> -> vector<16x128xf32>
    %c0_67 = arith.constant 0 : index
    %c0_68 = arith.constant 0 : index
    %107 = vector.load %arg9[%c0_67, %c0_68] : memref<1x128xf32, #tpu.memory_space<vmem>>, vector<1x128xf32>
    %108 = vector.broadcast %107 : vector<1x128xf32> to vector<16x128xf32>
    %109 = arith.addf %106, %108 : vector<16x128xf32>
    %cst_69 = arith.constant dense<0xFF800000> : vector<16xf32>
    %110 = vector.multi_reduction <maximumf>, %109, %cst_69 [1] : vector<16x128xf32> to vector<16xf32>
    %111 = vector.shape_cast %110 : vector<16xf32> to vector<16x1xf32>
    %112 = vector.broadcast %111 : vector<16x1xf32> to vector<16x128xf32>
    %113 = arith.subf %109, %112 : vector<16x128xf32>
    %114 = math.exp %113 : vector<16x128xf32>
    %cst_70 = arith.constant dense<0.000000e+00> : vector<16xf32>
    %115 = vector.multi_reduction <add>, %114, %cst_70 [1] : vector<16x128xf32> to vector<16xf32>
    %116 = vector.shape_cast %115 : vector<16xf32> to vector<16x1xf32>
    %117 = math.log %116 : vector<16x1xf32>
    %118 = vector.broadcast %117 : vector<16x1xf32> to vector<16x128xf32>
    %119 = arith.subf %113, %118 : vector<16x128xf32>
    %c0_71 = arith.constant 0 : index
    %c0_72 = arith.constant 0 : index
    %120 = vector.load %arg10[%c0_71, %c0_72] : memref<16x128xf32, #tpu.memory_space<vmem>>, vector<16x128xf32>
    tpu.vector_store %arg10[%c0_71, %c0_72], %119 {strides = array<i32>} : memref<16x128xf32, #tpu.memory_space<vmem>>, vector<16x128xf32>,
    return
  }
  func.func @transform_0(%arg0: i32) -> (i32, i32, i32) {
    %c0_i32 = arith.constant 0 : i32
    %c0_i32_0 = arith.constant 0 : i32
    %c0_i32_1 = arith.constant 0 : i32
    return %arg0, %c0_i32, %c0_i32_0 : i32, i32, i32
  }
  func.func @transform_1(%arg0: i32) -> (i32, i32) {
    %c0_i32 = arith.constant 0 : i32
    %c0_i32_0 = arith.constant 0 : i32
    %c0_i32_1 = arith.constant 0 : i32
    return %c0_i32, %c0_i32_0 : i32, i32
  }
  func.func @transform_2(%arg0: i32) -> (i32, i32, i32) {
    %c0_i32 = arith.constant 0 : i32
    %c0_i32_0 = arith.constant 0 : i32
    %c0_i32_1 = arith.constant 0 : i32
    %c0_i32_2 = arith.constant 0 : i32
    return %c0_i32, %c0_i32_0, %c0_i32_1 : i32, i32, i32
  }
  func.func @transform_3(%arg0: i32) -> (i32, i32) {
    %c0_i32 = arith.constant 0 : i32
    %c0_i32_0 = arith.constant 0 : i32
    %c0_i32_1 = arith.constant 0 : i32
    return %c0_i32, %c0_i32_0 : i32, i32
  }
  func.func @transform_4(%arg0: i32) -> (i32, i32) {
    %c0_i32 = arith.constant 0 : i32
    %c0_i32_0 = arith.constant 0 : i32
    %c0_i32_1 = arith.constant 0 : i32
    return %c0_i32, %c0_i32_0 : i32, i32
  }
  func.func @transform_5(%arg0: i32) -> (i32, i32, i32) {
    %c0_i32 = arith.constant 0 : i32
    %c0_i32_0 = arith.constant 0 : i32
    %c0_i32_1 = arith.constant 0 : i32
    %c0_i32_2 = arith.constant 0 : i32
    return %c0_i32, %c0_i32_0, %c0_i32_1 : i32, i32, i32
  }
  func.func @transform_6(%arg0: i32) -> (i32, i32) {
    %c0_i32 = arith.constant 0 : i32
    %c0_i32_0 = arith.constant 0 : i32
    %c0_i32_1 = arith.constant 0 : i32
    return %c0_i32, %c0_i32_0 : i32, i32
  }
  func.func @transform_7(%arg0: i32) -> (i32, i32) {
    %c0_i32 = arith.constant 0 : i32
    %c0_i32_0 = arith.constant 0 : i32
    %c0_i32_1 = arith.constant 0 : i32
    return %c0_i32, %c0_i32_0 : i32, i32
  }
  func.func @transform_8(%arg0: i32) -> (i32, i32) {
    %c0_i32 = arith.constant 0 : i32
    %c0_i32_0 = arith.constant 0 : i32
    %c0_i32_1 = arith.constant 0 : i32
    return %c0_i32, %c0_i32_0 : i32, i32
  }
  func.func @transform_9(%arg0: i32) -> (i32, i32) {
    %c0_i32 = arith.constant 0 : i32
    %c0_i32_0 = arith.constant 0 : i32
    return %arg0, %c0_i32 : i32, i32
  }
}

</mosaic_0001>

<bundles_post_ra>
// kernel: mynn_forward.1
= control target key start
LH: loop header
LB: loop body
LE: loop exit
PB: predicated region body
PF: predicated region fallthrough
CT: control target
= control target key end

     0   :  { %s4034_s30 = smov 0   ;;  %s4878_s0 = inlined_call_operand.vmem [shape: bf16[2,384,140], index: 0, kind: input, shape index: {}]   ;;  %s4879_s1 = inlined_call_operand.vmem [shape: bf16[140,256], index: 1, kind: input, shape index: {}]   ;;  %s4880_s2 = inlined_call_operand.vmem [shape: bf16[5,128,256], index: 2, kind: input, shape index: {}]   ;;  %s4881_s3 = inlined_call_operand.vmem [shape: f32[1,128], index: 3, kind: input, shape index: {}]   ;;  %s4882_s4 = inlined_call_operand.vmem [shape: f32[1,128], index: 4, kind: input, shape index: {}]   ;;  %s4883_s5 = inlined_call_operand.vmem [shape: bf16[4,128,128], index: 5, kind: input, shape index: {}]   ;;  %s4884_s6 = inlined_call_operand.vmem [shape: f32[1,128], index: 6, kind: input, shape index: {}]   ;;  %s4885_s7 = inlined_call_operand.vmem [shape: bf16[128,128], index: 7, kind: input, shape index: {}]   ;;  %s4886_s8 = inlined_call_operand.vmem [shape: f32[1,128], index: 8, kind: input, shape index: {}]   ;;  %s4887_s9 = inlined_call_operand.vmem [shape: f32[32,128], index: 9, kind: output, shape index: {}]  }
   0x1 LB: > { %s4040_s10 = sadd.s32 4294967295, %s3979_s30   ;;  %p3074_p0 = scmp.ge.s32.totalorder %s3979_s30, 1  ;;  %s3979_s30 = sphi %s4034_s30, %s19_s30  }
   0x2   : > { %p287_p1 = scmp.lt.s32.totalorder %s3979_s30, 3 }
   0x4   : > { %p288_p2 = pnand %p3074_p0, %p287_p1 }
   0x6   : > { %291 = sbr.rel (%p288_p2) target bundleno = 1717 (0x6b5), region = 56 }
   0xd   : > { %v3706_v0 = vld [vmem:[%s4879_s1 + $0x4] ss:$8 sps:$4 sm:$0xff]   ;;  %p323_p3 = scmp.lt.s32.totalorder %s4040_s10, 1  ;;  %v3708_v1 = vld [vmem:[%s4879_s1] ss:$8 sps:$4 sm:$0xff]   ;;  %vm705_vm0 = vcmask 97280  }
   0xe   : > { %785 = vmatprep.subr.bf16.mxu0 %v3706_v0  ;;  %v3709_v2 = vld [vmem:[%s4879_s1 + $0x14] ss:$8 sps:$4 sm:$0xff]   ;;  %v3711_v3 = vld [vmem:[%s4879_s1 + $0x10] ss:$8 sps:$4 sm:$0xff]   ;;  %v3712_v4 = vld [vmem:[%s4879_s1 + $0x24] ss:$8 sps:$4 sm:$0xff]  }
   0xf   : > { %s324_s17 = scalar_select %p323_p3, %s4040_s10, 1  ;;  %786 = vmatpush1.bf16.msra.mxu0 %v3708_v1  ;;  %v3714_v5 = vld [vmem:[%s4879_s1 + $0x20] ss:$8 sps:$4 sm:$0xff]   ;;  %v3715_v6 = vld [vmem:[%s4879_s1 + $0x34] ss:$8 sps:$4 sm:$0xff]   ;;  %vm778_vm1 = vcmask 1045504  }
  0x10   : > { %787 = vmatprep.subr.bf16.mxu0 %v3709_v2  ;;  %v3717_v7 = vld [vmem:[%s4879_s1 + $0x30] ss:$8 sps:$4 sm:$0xff]   ;;  %v3718_v8 = vld [vmem:[%s4879_s1 + $0x44] ss:$8 sps:$4 sm:$0xff]   ;;  %v3720_v10 = vld [vmem:[%s4879_s1 + $0x40] ss:$8 sps:$4 sm:$0xff]  }
  0x11   : > { %s3694_s22 = smul.u32 384, %s324_s17  ;;  %v3721_v11 = vld [vmem:[%s4879_s1 + $0x54] ss:$8 sps:$4 sm:$0xff]   ;;  %v3723_v12 = vld [vmem:[%s4879_s1 + $0x50] ss:$8 sps:$4 sm:$0xff]   ;;  %vm3983_vm2 = vmmov 0  }
  0x12   : > { %v3724_v13 = vld [vmem:[%s4879_s1 + $0x64] ss:$8 sps:$4 sm:$0xff]   ;;  %v3726_v14 = vld [vmem:[%s4879_s1 + $0x60] ss:$8 sps:$4 sm:$0xff]   ;;  %v3727_v15 = vld [vmem:[%s4879_s1 + $0x74] ss:$8 sps:$4 sm:$0xff]  }
  0x13   : > { %788 = vmatpush1.bf16.msra.mxu0 %v3711_v3  ;;  %s4070_s29 = scalar_lea.vmem %s4878_s0, %s3694_s22  ;;  %v3729_v16 = vld [vmem:[%s4879_s1 + $0x70] ss:$8 sps:$4 sm:$0xff]   ;;  %v3730_v17 = vld [vmem:[%s4879_s1 + $0x84] ss:$8 sps:$4 sm:$0x3f]   ;;  %s3076_s17 = sshll.u32 %s4040_s10, 1 }
  0x14   : > { %789 = vmatprep.subr.bf16.mxu0 %v3712_v4  ;;  %v3735_v9 = vld [vmem:[%s4070_s29 + $0x4] ss:$8 sps:$4 sm:$0xff]   ;;  %v3732_v18 = vld [vmem:[%s4879_s1 + $0x80] ss:$8 sps:$4 sm:$0x3f]   ;;  %p329_p4 = scmp.lt.s32.totalorder %s3076_s17, 3 }
  0x15   : > { %3145 = vmatprep.mubr.msk.bf16.mxu0 %vm705_vm0, %v3735_v9  ;;  %v780_v19 = vsel %vm778_vm1, %v3732_v18, 0  ;;  %v3733_v20 = vld [vmem:[%s4070_s29] ss:$8 sps:$4 sm:$0xff]   ;;  %v3736_v21 = vld [vmem:[%s4070_s29 + $0x14] ss:$8 sps:$4 sm:$0xff]  }
  0x16   : > { %v3738_v22 = vld [vmem:[%s4070_s29 + $0x10] ss:$8 sps:$4 sm:$0xff]   ;;  %v3739_v23 = vld [vmem:[%s4070_s29 + $0x24] ss:$8 sps:$4 sm:$0xff]   ;;  %v3741_v24 = vld [vmem:[%s4070_s29 + $0x20] ss:$8 sps:$4 sm:$0xff]  }
  0x17   : > { %790 = vmatpush1.bf16.msra.mxu0 %v3714_v5  ;;  %v3742_v25 = vld [vmem:[%s4070_s29 + $0x34] ss:$8 sps:$4 sm:$0xff]   ;;  %v3744_v26 = vld [vmem:[%s4070_s29 + $0x30] ss:$8 sps:$4 sm:$0xff]   ;;  %v3745_v27 = vld [vmem:[%s4070_s29 + $0x44] ss:$8 sps:$4 sm:$0xff]  }
  0x18   : > { %791 = vmatprep.subr.bf16.mxu0 %v3715_v6  ;;  %v3747_v28 = vld [vmem:[%s4070_s29 + $0x40] ss:$8 sps:$4 sm:$0xff]   ;;  %v3748_v29 = vld [vmem:[%s4070_s29 + $0x54] ss:$8 sps:$4 sm:$0xff]   ;;  %v3750_v30 = vld [vmem:[%s4070_s29 + $0x50] ss:$8 sps:$4 sm:$0xff]  }
  0x19   : > { %v3751_v31 = vld [vmem:[%s4070_s29 + $0x64] ss:$8 sps:$4 sm:$0xff]   ;;  %v3753_v32 = vld [vmem:[%s4070_s29 + $0x60] ss:$8 sps:$4 sm:$0xff]   ;;  %v3754_v33 = vld [vmem:[%s4070_s29 + $0x74] ss:$8 sps:$4 sm:$0xff]  }
  0x1a   : > { %v3756_v34 = vld [vmem:[%s4070_s29 + $0x70] ss:$8 sps:$4 sm:$0xff]   ;;  %v3757_v35 = vld [vmem:[%s4070_s29 + $0x84] ss:$8 sps:$4 sm:$0xff]   ;;  %v3759_v36 = vld [vmem:[%s4070_s29 + $0x80] ss:$8 sps:$4 sm:$0xff]  }
  0x1b   : > { %792 = vmatpush1.bf16.msra.mxu0 %v3717_v7  ;;  %v3760_v37 = vld [vmem:[%s4070_s29 + $0x94] ss:$8 sps:$4 sm:$0xff]   ;;  %v3762_v38 = vld [vmem:[%s4070_s29 + $0x90] ss:$8 sps:$4 sm:$0xff]   ;;  %v3763_v39 = vld [vmem:[%s4070_s29 + $0xa4] ss:$8 sps:$4 sm:$0xff]  }
  0x1c   : > { %793 = vmatprep.subr.bf16.mxu0 %v3718_v8  ;;  %v3765_v40 = vld [vmem:[%s4070_s29 + $0xa0] ss:$8 sps:$4 sm:$0xff]   ;;  %v3766_v41 = vld [vmem:[%s4070_s29 + $0xb4] ss:$8 sps:$4 sm:$0xff]   ;;  %v3768_v42 = vld [vmem:[%s4070_s29 + $0xb0] ss:$8 sps:$4 sm:$0xff]  }
  0x1d   : > { %v3769_v43 = vld [vmem:[%s4070_s29 + $0xc4] ss:$8 sps:$4 sm:$0xff]   ;;  %v3771_v44 = vld [vmem:[%s4070_s29 + $0xc0] ss:$8 sps:$4 sm:$0xff]   ;;  %v3772_v45 = vld [vmem:[%s4070_s29 + $0xd4] ss:$8 sps:$4 sm:$0xff]  }
  0x1e   : > { %v3774_v46 = vld [vmem:[%s4070_s29 + $0xd0] ss:$8 sps:$4 sm:$0xff]   ;;  %v3775_v47 = vld [vmem:[%s4070_s29 + $0xe4] ss:$8 sps:$4 sm:$0xff]   ;;  %v3777_v48 = vld [vmem:[%s4070_s29 + $0xe0] ss:$8 sps:$4 sm:$0xff]  }
  0x1f   : > { %794 = vmatpush1.bf16.msra.mxu0 %v3720_v10  ;;  %v3778_v49 = vld [vmem:[%s4070_s29 + $0xf4] ss:$8 sps:$4 sm:$0xff]   ;;  %v3780_v50 = vld [vmem:[%s4070_s29 + $0xf0] ss:$8 sps:$4 sm:$0xff]   ;;  %v3781_v51 = vld [vmem:[%s4070_s29 + $0x104] ss:$8 sps:$4 sm:$0xff]  }
  0x20   : > { %795 = vmatprep.subr.bf16.mxu0 %v3721_v11  ;;  %v3783_v52 = vld [vmem:[%s4070_s29 + $0x100] ss:$8 sps:$4 sm:$0xff]   ;;  %v3784_v53 = vld [vmem:[%s4070_s29 + $0x114] ss:$8 sps:$4 sm:$0xff]   ;;  %v3786_v54 = vld [vmem:[%s4070_s29 + $0x110] ss:$8 sps:$4 sm:$0xff]  }
  0x21   : > { %v3787_v55 = vld [vmem:[%s4070_s29 + $0x124] ss:$8 sps:$4 sm:$0xff]   ;;  %v3789_v56 = vld [vmem:[%s4070_s29 + $0x120] ss:$8 sps:$4 sm:$0xff]   ;;  %v3790_v57 = vld [vmem:[%s4070_s29 + $0x134] ss:$8 sps:$4 sm:$0xff]  }
  0x22   : > { %v3792_v58 = vld [vmem:[%s4070_s29 + $0x130] ss:$8 sps:$4 sm:$0xff]   ;;  %v3793_v59 = vld [vmem:[%s4070_s29 + $0x144] ss:$8 sps:$4 sm:$0xff]   ;;  %v3795_v60 = vld [vmem:[%s4070_s29 + $0x140] ss:$8 sps:$4 sm:$0xff]  }
  0x23   : > { %796 = vmatpush1.bf16.msra.mxu0 %v3723_v12  ;;  %v3796_v61 = vld [vmem:[%s4070_s29 + $0x154] ss:$8 sps:$4 sm:$0xff]   ;;  %v3798_v62 = vld [vmem:[%s4070_s29 + $0x150] ss:$8 sps:$4 sm:$0xff]   ;;  %v3799_v63 = vld [vmem:[%s4070_s29 + $0x164] ss:$8 sps:$4 sm:$0xff]  }
  0x24   : > { %797 = vmatprep.subr.bf16.mxu0 %v3724_v13  ;;  %v3805_v0 = vld [vmem:[%s4880_s2 + $0x84] ss:$8 sps:$4 sm:$0xff]   ;;  %v3807_v1 = vld [vmem:[%s4880_s2 + $0x80] ss:$8 sps:$4 sm:$0xff]   ;;  %v3808_v2 = vld [vmem:[%s4880_s2 + $0x94] ss:$8 sps:$4 sm:$0xff]  }
  0x25   : > { %1331 = vmatprep.subr.bf16.mxu1 %v3805_v0  ;;  %v3801_v3 = vld [vmem:[%s4070_s29 + $0x160] ss:$8 sps:$4 sm:$0xff]   ;;  %v3810_v4 = vld [vmem:[%s4880_s2 + $0x90] ss:$8 sps:$4 sm:$0xff]   ;;  %v3802_v5 = vld [vmem:[%s4070_s29 + $0x174] ss:$8 sps:$4 sm:$0xff]  }
  0x26   : > { %1332 = vmatpush1.bf16.msra.mxu1 %v3807_v1  ;;  %v3811_v6 = vld [vmem:[%s4880_s2 + $0xa4] ss:$8 sps:$4 sm:$0xff]   ;;  %v3813_v7 = vld [vmem:[%s4880_s2 + $0xa0] ss:$8 sps:$4 sm:$0xff]   ;;  %v3814_v8 = vld [vmem:[%s4880_s2 + $0xb4] ss:$8 sps:$4 sm:$0xff]  }
  0x27   : > { %798 = vmatpush1.bf16.msra.mxu0 %v3726_v14  ;;  %1333 = vmatprep.subr.bf16.mxu1 %v3808_v2  ;;  %v3804_v9 = vld [vmem:[%s4070_s29 + $0x170] ss:$8 sps:$4 sm:$0xff]   ;;  %v3817_v11 = vld [vmem:[%s4880_s2 + $0xc4] ss:$8 sps:$4 sm:$0xff]   ;;  %v3819_v12 = vld [vmem:[%s4880_s2 + $0xc0] ss:$8 sps:$4 sm:$0xff]  }
  0x28   : > { %799 = vmatprep.subr.bf16.mxu0 %v3727_v15  ;;  %v3816_v10 = vld [vmem:[%s4880_s2 + $0xb0] ss:$8 sps:$4 sm:$0xff]   ;;  %v3820_v13 = vld [vmem:[%s4880_s2 + $0xd4] ss:$8 sps:$4 sm:$0xff]   ;;  %v3823_v15 = vld [vmem:[%s4880_s2 + $0xe4] ss:$8 sps:$4 sm:$0xff]  }
  0x29   : > { %v3822_v14 = vld [vmem:[%s4880_s2 + $0xd0] ss:$8 sps:$4 sm:$0xff]   ;;  %s4894_s17 = smov (!%p329_p4, %s3076_s17), 3 }
  0x2a   : > { %1334 = vmatpush1.bf16.msra.mxu1 %v3810_v4  ;;  %v3828_v18 = vld [vmem:[%s4880_s2 + $0xf0] ss:$8 sps:$4 sm:$0xff]   ;;  %s3077_s18 = sshll.u32 %s4894_s17, 3 }
  0x2b   : > { %800 = vmatpush1.bf16.msra.mxu0 %v3729_v16  ;;  %1335 = vmatprep.subr.bf16.mxu1 %v3811_v6  ;;  %v3825_v16 = vld [vmem:[%s4880_s2 + $0xe0] ss:$8 sps:$4 sm:$0xff]   ;;  %s332_s20 = scalar_lea.vmem %s4887_s9, %s3077_s18 }
  0x2c   : > { %3144 = vmatprep.subr.msk.bf16.mxu0 %vm778_vm1, %v3730_v17  ;;  %v3826_v17 = vld [vmem:[%s4880_s2 + $0xf4] ss:$8 sps:$4 sm:$0xff]  }
  0x2e   : > { %1336 = vmatpush1.bf16.msra.mxu1 %v3813_v7 }
  0x2f   : > { %802 = vmatpush1.bf16.msra.mxu0 %v780_v19  ;;  %1337 = vmatprep.subr.bf16.mxu1 %v3814_v8  ;;  %v4888_v19 = vmov 0  }
  0x30   : > { %1363 = vmatprep.mubr.bf16.mxu1 %v4888_v19 }
  0x32   : > { %818 = vmatmul.mubr.bf16.vlgmr.msra.gmra.mrb[0].mxu0 %v3733_v20  ;;  %1338 = vmatpush1.bf16.msra.mxu1 %v3816_v10  ;;  %v3831_v20 = vld [vmem:[%s4880_s2 + $0x4] ss:$8 sps:$4 sm:$0xff]   ;;  %v4320_v10 = vld [vmem:[%s4881_s3] ss:$0 sm:$0xff] }
  0x33   : > { %3146 = vmatprep.mubr.msk.bf16.mxu0 %vm705_vm0, %v3736_v21  ;;  %1339 = vmatprep.subr.bf16.mxu1 %v3817_v11 }
  0x36   : > { %1340 = vmatpush1.bf16.msra.mxu1 %v3819_v12 }
  0x37   : > { %1341 = vmatprep.subr.bf16.mxu1 %v3820_v13 }
  0x3a   : > { %828 = vmatmul.mubr.bf16.gmra.mrb[4].mxu0 %v3738_v22  ;;  %1342 = vmatpush1.bf16.msra.mxu1 %v3822_v14 }
  0x3b   : > { %3147 = vmatprep.mubr.msk.bf16.mxu0 %vm705_vm0, %v3739_v23  ;;  %1343 = vmatprep.subr.bf16.mxu1 %v3823_v15 }
  0x3e   : > { %1344 = vmatpush1.bf16.msra.mxu1 %v3825_v16 }
  0x3f   : > { %1345 = vmatprep.subr.bf16.mxu1 %v3826_v17 }
  0x42   : > { %838 = vmatmul.mubr.bf16.gmra.mrb[8].mxu0 %v3741_v24  ;;  %1346 = vmatpush1.bf16.msra.mxu1 %v3828_v18 }
  0x43   : > { %3148 = vmatprep.mubr.msk.bf16.mxu0 %vm705_vm0, %v3742_v25  ;;  %1524 = vmatprep.subr.bf16.mxu1 %v3831_v20 }
  0x4a   : > { %848 = vmatmul.mubr.bf16.gmra.mrb[12].mxu0 %v3744_v26 }
  0x4b   : > { %3149 = vmatprep.mubr.msk.bf16.mxu0 %vm705_vm0, %v3745_v27 }
  0x52   : > { %858 = vmatmul.mubr.bf16.gmra.mrb[16].mxu0 %v3747_v28 }
  0x53   : > { %3150 = vmatprep.mubr.msk.bf16.mxu0 %vm705_vm0, %v3748_v29 }
  0x5a   : > { %868 = vmatmul.mubr.bf16.gmra.mrb[20].mxu0 %v3750_v30 }
  0x5b   : > { %3151 = vmatprep.mubr.msk.bf16.mxu0 %vm705_vm0, %v3751_v31 }
  0x62   : > { %878 = vmatmul.mubr.bf16.gmra.mrb[24].mxu0 %v3753_v32 }
  0x63   : > { %3152 = vmatprep.mubr.msk.bf16.mxu0 %vm705_vm0, %v3754_v33 }
  0x6a   : > { %888 = vmatmul.mubr.bf16.gmra.mrb[28].mxu0 %v3756_v34 }
  0x6b   : > { %3153 = vmatprep.mubr.msk.bf16.mxu0 %vm705_vm0, %v3757_v35 }
  0x72   : > { %898 = vmatmul.mubr.bf16.gmra.mrb[32].mxu0 %v3759_v36 }
  0x73   : > { %3154 = vmatprep.mubr.msk.bf16.mxu0 %vm705_vm0, %v3760_v37 }
  0x7a   : > { %908 = vmatmul.mubr.bf16.gmra.mrb[36].mxu0 %v3762_v38 }
  0x7b   : > { %3155 = vmatprep.mubr.msk.bf16.mxu0 %vm705_vm0, %v3763_v39 }
  0x82   : > { %918 = vmatmul.mubr.bf16.gmra.mrb[40].mxu0 %v3765_v40 }
  0x83   : > { %3156 = vmatprep.mubr.msk.bf16.mxu0 %vm705_vm0, %v3766_v41 }
  0x8a   : > { %928 = vmatmul.mubr.bf16.gmra.mrb[44].mxu0 %v3768_v42 }
  0x8b   : > { %3157 = vmatprep.mubr.msk.bf16.mxu0 %vm705_vm0, %v3769_v43 }
  0x92   : > { %938 = vmatmul.mubr.bf16.gmra.mrb[48].mxu0 %v3771_v44 }
  0x93   : > { %3158 = vmatprep.mubr.msk.bf16.mxu0 %vm705_vm0, %v3772_v45 }
  0x9a   : > { %948 = vmatmul.mubr.bf16.gmra.mrb[52].mxu0 %v3774_v46 }
  0x9b   : > { %3159 = vmatprep.mubr.msk.bf16.mxu0 %vm705_vm0, %v3775_v47 }
  0xa2   : > { %958 = vmatmul.mubr.bf16.gmra.mrb[56].mxu0 %v3777_v48 }
  0xa3   : > { %3160 = vmatprep.mubr.msk.bf16.mxu0 %vm705_vm0, %v3778_v49 }
  0xaa   : > { %968 = vmatmul.mubr.bf16.gmra.mrb[60].mxu0 %v3780_v50 }
  0xab   : > { %3161 = vmatprep.mubr.msk.bf16.mxu0 %vm705_vm0, %v3781_v51 }
  0xb2   : > { %978 = vmatmul.mubr.bf16.gmra.mrb[64].mxu0 %v3783_v52 }
  0xb3   : > { %3162 = vmatprep.mubr.msk.bf16.mxu0 %vm705_vm0, %v3784_v53 }
  0xba   : > { %988 = vmatmul.mubr.bf16.gmra.mrb[68].mxu0 %v3786_v54 }
  0xbb   : > { %3163 = vmatprep.mubr.msk.bf16.mxu0 %vm705_vm0, %v3787_v55 }
  0xc2   : > { %998 = vmatmul.mubr.bf16.gmra.mrb[72].mxu0 %v3789_v56 }
  0xc3   : > { %3164 = vmatprep.mubr.msk.bf16.mxu0 %vm705_vm0, %v3790_v57 }
  0xca   : > { %1008 = vmatmul.mubr.bf16.gmra.mrb[76].mxu0 %v3792_v58 }
  0xcb   : > { %3165 = vmatprep.mubr.msk.bf16.mxu0 %vm705_vm0, %v3793_v59 }
  0xd2   : > { %1018 = vmatmul.mubr.bf16.gmra.mrb[80].mxu0 %v3795_v60 }
  0xd3   : > { %3166 = vmatprep.mubr.msk.bf16.mxu0 %vm705_vm0, %v3796_v61 }
  0xda   : > { %1028 = vmatmul.mubr.bf16.gmra.mrb[84].mxu0 %v3798_v62 }
  0xdb   : > { %3167 = vmatprep.mubr.msk.bf16.mxu0 %vm705_vm0, %v3799_v63 }
  0xe2   : > { %1038 = vmatmul.mubr.bf16.gmra.mrb[88].mxu0 %v3801_v3 }
  0xe3   : > { %3168 = vmatprep.mubr.msk.bf16.mxu0 %vm705_vm0, %v3802_v5 }
  0xea   : > { %1048 = vmatmul.mubr.bf16.gmra.mrb[92].mxu0 %v3804_v9 }
 0x105   : > { %v819_v21 = vpop.f32.mrb[0].mxu0 }
 0x106   : > { %v821_v22 = vpop.f32.mrb[1].mxu0 }
 0x107   : > { %v823_v23 = vpop.f32.mrb[2].mxu0 }
 0x108   : > { %v825_v24 = vpop.f32.mrb[3].mxu0 }
 0x10d   : > { %v4229_v25 = vpop.f32.mrb[4].mxu0 }
 0x10e   : > { %v4231_v26 = vpop.f32.mrb[5].mxu0 }
 0x10f   : > { %v4233_v27 = vpop.f32.mrb[6].mxu0 }
 0x110   : > { %v4235_v28 = vpop.f32.mrb[7].mxu0 }
 0x115   : > { %v4237_v29 = vpop.f32.mrb[8].mxu0 }
 0x116   : > { %v4239_v30 = vpop.f32.mrb[9].mxu0 }
 0x117   : > { %v4241_v31 = vpop.f32.mrb[10].mxu0 }
 0x118   : > { %v4243_v32 = vpop.f32.mrb[11].mxu0 }
 0x11d   : > { %v4245_v33 = vpop.f32.mrb[12].mxu0 }
 0x11e   : > { %v4247_v34 = vpop.f32.mrb[13].mxu0 }
 0x11f   : > { %v4249_v35 = vpop.f32.mrb[14].mxu0 }
 0x120   : > { %v4251_v36 = vpop.f32.mrb[15].mxu0 }
 0x125   : > { %v4253_v37 = vpop.f32.mrb[16].mxu0 }
 0x126   : > { %v4255_v38 = vpop.f32.mrb[17].mxu0 }
 0x127   : > { %v4257_v39 = vpop.f32.mrb[18].mxu0 }
 0x128   : > { %v4259_v40 = vpop.f32.mrb[19].mxu0 }
 0x12d   : > { %v4261_v41 = vpop.f32.mrb[20].mxu0 }
 0x12e   : > { %v4263_v42 = vpop.f32.mrb[21].mxu0 }
 0x12f   : > { %v4265_v43 = vpop.f32.mrb[22].mxu0 }
 0x130   : > { %v4267_v44 = vpop.f32.mrb[23].mxu0 }
 0x135   : > { %v4269_v45 = vpop.f32.mrb[24].mxu0 }
 0x136   : > { %v4271_v46 = vpop.f32.mrb[25].mxu0 }
 0x137   : > { %v4273_v47 = vpop.f32.mrb[26].mxu0 }
 0x138   : > { %v4275_v48 = vpop.f32.mrb[27].mxu0 }
 0x13d   : > { %v4277_v49 = vpop.f32.mrb[28].mxu0 }
 0x13e   : > { %v4279_v50 = vpop.f32.mrb[29].mxu0 }
 0x13f   : > { %v4281_v51 = vpop.f32.mrb[30].mxu0 }
 0x140   : > { %v4283_v52 = vpop.f32.mrb[31].mxu0 }
 0x145   : > { %v4285_v53 = vpop.f32.mrb[32].mxu0 }
 0x146   : > { %v4287_v54 = vpop.f32.mrb[33].mxu0 }
 0x147   : > { %v4289_v55 = vpop.f32.mrb[34].mxu0 }
 0x148   : > { %v4291_v56 = vpop.f32.mrb[35].mxu0 }
 0x14d   : > { %v4293_v57 = vpop.f32.mrb[36].mxu0 }
 0x14e   : > { %v4295_v58 = vpop.f32.mrb[37].mxu0 }
 0x14f   : > { %v4297_v59 = vpop.f32.mrb[38].mxu0 }
 0x150   : > { %v4299_v60 = vpop.f32.mrb[39].mxu0 }
 0x155   : > { %v4301_v61 = vpop.f32.mrb[40].mxu0 }
 0x156   : > { %v4303_v62 = vpop.f32.mrb[41].mxu0 }
 0x157   : > { %v4305_v63 = vpop.f32.mrb[42].mxu0 }
 0x158   : > { %v4307_v0 = vpop.f32.mrb[43].mxu0 }
 0x15d   : > { %v4309_v1 = vpop.f32.mrb[44].mxu0 }
 0x15e   : > { %v4311_v2 = vpop.f32.mrb[45].mxu0 }
 0x15f   : > { %v4313_v3 = vpop.f32.mrb[46].mxu0 }
 0x160   : > { %v4315_v4 = vpop.f32.mrb[47].mxu0 }
 0x161   : > { %4890 = vst [vmem:[#allocation3_spill] sm:$0xff] %v4315_v4 }
 0x165   : > { %v939_v5 = vpop.f32.mrb[48].mxu0 }
 0x166   : > { %v1058_v6 = vmax.f32 %v819_v21, %v939_v5  ;;  %v941_v7 = vpop.f32.mrb[49].mxu0 }
 0x167   : > { %v1059_v8 = vmax.f32 %v821_v22, %v941_v7  ;;  %v943_v9 = vpop.f32.mrb[50].mxu0 }
 0x168   : > { %v1060_v11 = vmax.f32 %v823_v23, %v943_v9  ;;  %v945_v12 = vpop.f32.mrb[51].mxu0 }
 0x169   : > { %v1106_v13 = vmax.f32 %v1058_v6, %v1059_v8  ;;  %v1061_v14 = vmax.f32 %v825_v24, %v945_v12 }
 0x16b   : > { %v1137_v15 = vadd.f32 %v4320_v10, %v1106_v13  ;;  %v1107_v16 = vmax.f32 %v1060_v11, %v1061_v14 }
 0x16d   : > { %v1138_v17 = vadd.f32 %v4320_v10, %v1107_v16  ;;  %v949_v18 = vpop.f32.mrb[52].mxu0  ;;  %v1161_v22 = vmax.f32 %v1137_v15, 0.0 }
 0x16e   : > { %v1062_v20 = vmax.f32 %v4229_v25, %v949_v18  ;;  %v951_v21 = vpop.f32.mrb[53].mxu0 }
 0x16f   : > { %v1162_v5 = vmax.f32 %v1138_v17, 0.0  ;;  %v1063_v7 = vmax.f32 %v4231_v26, %v951_v21  ;;  %v953_v19 = vpop.f32.mrb[54].mxu0 }
 0x170   : > { %v1064_v4 = vmax.f32 %v4233_v27, %v953_v19  ;;  %v955_v23 = vpop.f32.mrb[55].mxu0 }
 0x171   : > { %v4327_v9 = vpack.c.bf16 %v1162_v5, %v1161_v22  ;;  %v1108_v24 = vmax.f32 %v1062_v20, %v1063_v7  ;;  %v1065_v6 = vmax.f32 %v4235_v28, %v955_v23  ;;  %v3829_v28 = vld [vmem:[%s4880_s2] ss:$8 sps:$4 sm:$0xff]   ;;  %v3832_v22 = vld [vmem:[%s4880_s2 + $0x10] ss:$8 sps:$4 sm:$0xff]   ;;  %v3837_v7 = vld [vmem:[%s4880_s2 + $0x24] ss:$8 sps:$4 sm:$0xff]  }
 0x173   : > { %v1139_v8 = vadd.f32 %v4320_v10, %v1108_v24  ;;  %v1109_v11 = vmax.f32 %v1064_v4, %v1065_v6 }
 0x175   : > { %v1140_v12 = vadd.f32 %v4320_v10, %v1109_v11  ;;  %v959_v25 = vpop.f32.mrb[56].mxu0  ;;  %v1163_v15 = vmax.f32 %v1139_v8, 0.0 }
 0x176   : > { %v1066_v13 = vmax.f32 %v4237_v29, %v959_v25  ;;  %v961_v14 = vpop.f32.mrb[57].mxu0  ;;  %v3834_v29 = vld [vmem:[%s4880_s2 + $0x14] ss:$8 sps:$4 sm:$0xff]  }
 0x177   : > { %v1164_v26 = vmax.f32 %v1140_v12, 0.0  ;;  %v1067_v16 = vmax.f32 %v4239_v30, %v961_v14  ;;  %v963_v19 = vpop.f32.mrb[58].mxu0  ;;  %v3835_v14 = vld [vmem:[%s4880_s2 + $0x20] ss:$8 sps:$4 sm:$0xff]  }
 0x178   : > { %v1068_v27 = vmax.f32 %v4241_v31, %v963_v19  ;;  %v965_v17 = vpop.f32.mrb[59].mxu0  ;;  %v4891_v31 = vmov 0  }
 0x179   : > { %v1110_v18 = vmax.f32 %v1066_v13, %v1067_v16  ;;  %v1069_v4 = vmax.f32 %v4243_v32, %v965_v17  ;;  %v4339_v20 = vpack.c.bf16 %v1164_v26, %v1163_v15  ;;  %v3843_v17 = vld [vmem:[%s4880_s2 + $0x44] ss:$8 sps:$4 sm:$0xff]  }
 0x17b   : > { %v1141_v21 = vadd.f32 %v4320_v10, %v1110_v18  ;;  %v1111_v30 = vmax.f32 %v1068_v27, %v1069_v4  ;;  %1364 = vmatmul.mubr.bf16.vlgmr.msra.gmra.mrb[0].mxu1 %v4339_v20 }
 0x17c   : > { %1525 = vmatpush1.bf16.msra.mxu1 %v3829_v28  ;;  %1373 = vmatprep.mubr.bf16.mxu1 %v4891_v31 }
 0x17d   : > { %v1142_v32 = vadd.f32 %v4320_v10, %v1111_v30  ;;  %v969_v5 = vpop.f32.mrb[60].mxu0  ;;  %1526 = vmatprep.subr.bf16.mxu1 %v3834_v29  ;;  %v1165_v6 = vmax.f32 %v1141_v21, 0.0 }
 0x17e   : > { %v1070_v23 = vmax.f32 %v4245_v33, %v969_v5  ;;  %v971_v24 = vpop.f32.mrb[61].mxu0  ;;  %v3840_v33 = vld [vmem:[%s4880_s2 + $0x34] ss:$8 sps:$4 sm:$0xff]   ;;  %v3841_v5 = vld [vmem:[%s4880_s2 + $0x40] ss:$8 sps:$4 sm:$0xff]  }
 0x17f   : > { %v1166_v8 = vmax.f32 %v1142_v32, 0.0  ;;  %v1071_v11 = vmax.f32 %v4247_v34, %v971_v24  ;;  %v973_v12 = vpop.f32.mrb[62].mxu0 }
 0x180   : > { %v1072_v25 = vmax.f32 %v4249_v35, %v973_v12  ;;  %v975_v13 = vpop.f32.mrb[63].mxu0  ;;  %1527 = vmatpush1.bf16.msra.mxu1 %v3832_v22  ;;  %v3838_v35 = vld [vmem:[%s4880_s2 + $0x30] ss:$8 sps:$4 sm:$0xff]  }
 0x181   : > { %v1112_v15 = vmax.f32 %v1070_v23, %v1071_v11  ;;  %v1073_v26 = vmax.f32 %v4251_v36, %v975_v13  ;;  %v4361_v16 = vpack.c.bf16 %v1166_v8, %v1165_v6  ;;  %1528 = vmatprep.subr.bf16.mxu1 %v3837_v7  ;;  %v3849_v11 = vld [vmem:[%s4880_s2 + $0x64] ss:$8 sps:$4 sm:$0xff]  }
 0x183   : > { %v1143_v34 = vadd.f32 %v4320_v10, %v1112_v15  ;;  %v1113_v19 = vmax.f32 %v1072_v25, %v1073_v26  ;;  %1374 = vmatmul.mubr.bf16.gmra.mrb[4].mxu1 %v4361_v16 }
 0x184   : > { %1383 = vmatprep.mubr.bf16.mxu1 %v4891_v31  ;;  %1529 = vmatpush1.bf16.msra.mxu1 %v3835_v14 }
 0x185   : > { %v1144_v36 = vadd.f32 %v4320_v10, %v1113_v19  ;;  %v979_v27 = vpop.f32.mrb[64].mxu0  ;;  %1530 = vmatprep.subr.bf16.mxu1 %v3840_v33  ;;  %v1167_v4 = vmax.f32 %v1143_v34, 0.0  ;;  %v3847_v19 = vld [vmem:[%s4880_s2 + $0x60] ss:$8 sps:$4 sm:$0xff]  }
 0x186   : > { %v1074_v28 = vmax.f32 %v4253_v37, %v979_v27  ;;  %v981_v18 = vpop.f32.mrb[65].mxu0  ;;  %v3846_v37 = vld [vmem:[%s4880_s2 + $0x54] ss:$8 sps:$4 sm:$0xff]  }
 0x187   : > { %v1168_v29 = vmax.f32 %v1144_v36, 0.0  ;;  %v1075_v21 = vmax.f32 %v4255_v38, %v981_v18  ;;  %v983_v30 = vpop.f32.mrb[66].mxu0  ;;  %v3855_v18 = vld [vmem:[%s4880_s2 + $0x104] ss:$8 sps:$4 sm:$0xff]  }
 0x188   : > { %v1076_v22 = vmax.f32 %v4257_v39, %v983_v30  ;;  %v985_v32 = vpop.f32.mrb[67].mxu0  ;;  %1531 = vmatpush1.bf16.msra.mxu1 %v3838_v35  ;;  %v3844_v39 = vld [vmem:[%s4880_s2 + $0x50] ss:$8 sps:$4 sm:$0xff]  }
 0x189   : > { %v4382_v7 = vpack.c.bf16 %v1168_v29, %v1167_v4  ;;  %v1114_v23 = vmax.f32 %v1074_v28, %v1075_v21  ;;  %v1077_v24 = vmax.f32 %v4259_v40, %v985_v32  ;;  %1532 = vmatprep.subr.bf16.mxu1 %v3843_v17 }
 0x18b   : > { %v1145_v38 = vadd.f32 %v4320_v10, %v1114_v23  ;;  %v1115_v6 = vmax.f32 %v1076_v22, %v1077_v24  ;;  %1384 = vmatmul.mubr.bf16.gmra.mrb[8].mxu1 %v4382_v7 }
 0x18c   : > { %1393 = vmatprep.mubr.bf16.mxu1 %v4891_v31  ;;  %1533 = vmatpush1.bf16.msra.mxu1 %v3841_v5 }
 0x18d   : > { %v1146_v8 = vadd.f32 %v4320_v10, %v1115_v6  ;;  %v989_v40 = vpop.f32.mrb[68].mxu0  ;;  %1534 = vmatprep.subr.bf16.mxu1 %v3846_v37  ;;  %v1169_v13 = vmax.f32 %v1145_v38, 0.0 }
 0x18e   : > { %v1078_v12 = vmax.f32 %v4261_v41, %v989_v40  ;;  %v991_v25 = vpop.f32.mrb[69].mxu0  ;;  %v3852_v41 = vld [vmem:[%s4880_s2 + $0x74] ss:$8 sps:$4 sm:$0xff]  }
 0x18f   : > { %v1170_v14 = vmax.f32 %v1146_v8, 0.0  ;;  %v1079_v15 = vmax.f32 %v4263_v42, %v991_v25  ;;  %v993_v26 = vpop.f32.mrb[70].mxu0 }
 0x190   : > { %v1080_v33 = vmax.f32 %v4265_v43, %v993_v26  ;;  %v995_v34 = vpop.f32.mrb[71].mxu0  ;;  %1535 = vmatpush1.bf16.msra.mxu1 %v3844_v39  ;;  %v3850_v43 = vld [vmem:[%s4880_s2 + $0x70] ss:$8 sps:$4 sm:$0xff]  }
 0x191   : > { %v4404_v35 = vpack.c.bf16 %v1170_v14, %v1169_v13  ;;  %v1116_v36 = vmax.f32 %v1078_v12, %v1079_v15  ;;  %v1081_v27 = vmax.f32 %v4267_v44, %v995_v34  ;;  %1536 = vmatprep.subr.bf16.mxu1 %v3849_v11 }
 0x193   : > { %v1147_v42 = vadd.f32 %v4320_v10, %v1116_v36  ;;  %v1117_v17 = vmax.f32 %v1080_v33, %v1081_v27  ;;  %1394 = vmatmul.mubr.bf16.gmra.mrb[12].mxu1 %v4404_v35 }
 0x194   : > { %1403 = vmatprep.mubr.bf16.mxu1 %v4891_v31  ;;  %1537 = vmatpush1.bf16.msra.mxu1 %v3847_v19 }
 0x195   : > { %v1148_v28 = vadd.f32 %v4320_v10, %v1117_v17  ;;  %v999_v44 = vpop.f32.mrb[72].mxu0  ;;  %1538 = vmatprep.subr.bf16.mxu1 %v3852_v41  ;;  %v1171_v21 = vmax.f32 %v1147_v42, 0.0 }
 0x196   : > { %v1082_v4 = vmax.f32 %v4269_v45, %v999_v44  ;;  %v1001_v29 = vpop.f32.mrb[73].mxu0 }
 0x197   : > { %v1172_v30 = vmax.f32 %v1148_v28, 0.0  ;;  %v1083_v22 = vmax.f32 %v4271_v46, %v1001_v29  ;;  %v1003_v32 = vpop.f32.mrb[74].mxu0 }
 0x198   : > { %v1084_v5 = vmax.f32 %v4273_v47, %v1003_v32  ;;  %v1005_v23 = vpop.f32.mrb[75].mxu0  ;;  %1539 = vmatpush1.bf16.msra.mxu1 %v3850_v43 }
 0x199   : > { %v4423_v24 = vpack.c.bf16 %v1172_v30, %v1171_v21  ;;  %v1118_v37 = vmax.f32 %v1082_v4, %v1083_v22  ;;  %v1085_v38 = vmax.f32 %v4275_v48, %v1005_v23  ;;  %1742 = vmatprep.subr.bf16.mxu1 %v3855_v18 }
 0x19b   : > { %v1149_v6 = vadd.f32 %v4320_v10, %v1118_v37  ;;  %v1119_v39 = vmax.f32 %v1084_v5, %v1085_v38  ;;  %1404 = vmatmul.mubr.bf16.gmra.mrb[16].mxu1 %v4423_v24 }
 0x19c   : > { %1413 = vmatprep.mubr.bf16.mxu1 %v4891_v31 }
 0x19d   : > { %v1150_v45 = vadd.f32 %v4320_v10, %v1119_v39  ;;  %v1009_v46 = vpop.f32.mrb[76].mxu0  ;;  %v1173_v40 = vmax.f32 %v1149_v6, 0.0 }
 0x19e   : > { %v1086_v47 = vmax.f32 %v4277_v49, %v1009_v46  ;;  %v1011_v8 = vpop.f32.mrb[77].mxu0 }
 0x19f   : > { %v1174_v11 = vmax.f32 %v1150_v45, 0.0  ;;  %v1087_v12 = vmax.f32 %v4279_v50, %v1011_v8  ;;  %v1013_v25 = vpop.f32.mrb[78].mxu0 }
 0x1a0   : > { %v1088_v48 = vmax.f32 %v4281_v51, %v1013_v25  ;;  %v1015_v13 = vpop.f32.mrb[79].mxu0 }
 0x1a1   : > { %v4433_v14 = vpack.c.bf16 %v1174_v11, %v1173_v40  ;;  %v1120_v15 = vmax.f32 %v1086_v47, %v1087_v12  ;;  %v1089_v26 = vmax.f32 %v4283_v52, %v1015_v13  ;;  %v3853_v12 = vld [vmem:[%s4880_s2 + $0x100] ss:$8 sps:$4 sm:$0xff]  }
 0x1a3   : > { %v1151_v33 = vadd.f32 %v4320_v10, %v1120_v15  ;;  %v1121_v34 = vmax.f32 %v1088_v48, %v1089_v26  ;;  %1414 = vmatmul.mubr.bf16.gmra.mrb[20].mxu1 %v4433_v14 }
 0x1a4   : > { %1423 = vmatprep.mubr.bf16.mxu1 %v4891_v31 }
 0x1a5   : > { %v1152_v49 = vadd.f32 %v4320_v10, %v1121_v34  ;;  %v1019_v19 = vpop.f32.mrb[80].mxu0  ;;  %v1175_v51 = vmax.f32 %v1151_v33, 0.0  ;;  %v3861_v33 = vld [vmem:[%s4880_s2 + $0x124] ss:$8 sps:$4 sm:$0xff]  }
 0x1a6   : > { %v1090_v50 = vmax.f32 %v4285_v53, %v1019_v19  ;;  %v1021_v36 = vpop.f32.mrb[81].mxu0 }
 0x1a7   : > { %v1176_v27 = vmax.f32 %v1152_v49, 0.0  ;;  %v1091_v41 = vmax.f32 %v4287_v54, %v1021_v36  ;;  %v1023_v42 = vpop.f32.mrb[82].mxu0 }
 0x1a8   : > { %v1092_v52 = vmax.f32 %v4289_v55, %v1023_v42  ;;  %v1025_v17 = vpop.f32.mrb[83].mxu0 }
 0x1a9   : > { %v4443_v43 = vpack.c.bf16 %v1176_v27, %v1175_v51  ;;  %v1122_v28 = vmax.f32 %v1090_v50, %v1091_v41  ;;  %v1093_v44 = vmax.f32 %v4291_v56, %v1025_v17  ;;  %v3859_v41 = vld [vmem:[%s4880_s2 + $0x120] ss:$8 sps:$4 sm:$0xff]  }
 0x1ab   : > { %v1153_v18 = vadd.f32 %v4320_v10, %v1122_v28  ;;  %v1123_v4 = vmax.f32 %v1092_v52, %v1093_v44  ;;  %1424 = vmatmul.mubr.bf16.gmra.mrb[24].mxu1 %v4443_v43  ;;  %v4892_v52 = vld [vmem:[#allocation3_spill] sm:$0xff] }
 0x1ac   : > { %1433 = vmatprep.mubr.bf16.mxu1 %v4891_v31 }
 0x1ad   : > { %v1154_v53 = vadd.f32 %v4320_v10, %v1123_v4  ;;  %v1029_v29 = vpop.f32.mrb[84].mxu0  ;;  %v1177_v55 = vmax.f32 %v1153_v18, 0.0  ;;  %v3867_v4 = vld [vmem:[%s4880_s2 + $0x144] ss:$8 sps:$4 sm:$0xff]  }
 0x1ae   : > { %v1094_v54 = vmax.f32 %v4293_v57, %v1029_v29  ;;  %v1031_v21 = vpop.f32.mrb[85].mxu0 }
 0x1af   : > { %v1178_v30 = vmax.f32 %v1154_v53, 0.0  ;;  %v1095_v22 = vmax.f32 %v4295_v58, %v1031_v21  ;;  %v1033_v32 = vpop.f32.mrb[86].mxu0 }
 0x1b0   : > { %v1096_v56 = vmax.f32 %v4297_v59, %v1033_v32  ;;  %v1035_v5 = vpop.f32.mrb[87].mxu0  ;;  %v3874_v32 = vld [vmem:[%s4880_s2 + $0x170] ss:$8 sps:$4 sm:$0xff]  }
 0x1b1   : > { %v4453_v23 = vpack.c.bf16 %v1178_v30, %v1177_v55  ;;  %v1124_v37 = vmax.f32 %v1094_v54, %v1095_v22  ;;  %v1097_v38 = vmax.f32 %v4299_v60, %v1035_v5  ;;  %v3870_v54 = vld [vmem:[%s4880_s2 + $0x154] ss:$8 sps:$4 sm:$0xff]   ;;  %v3873_v55 = vld [vmem:[%s4880_s2 + $0x164] ss:$8 sps:$4 sm:$0xff]   ;;  %v3871_v30 = vld [vmem:[%s4880_s2 + $0x160] ss:$8 sps:$4 sm:$0xff]  }
 0x1b2   : > { %v3876_v22 = vld [vmem:[%s4880_s2 + $0x174] ss:$8 sps:$4 sm:$0xff]   ;;  %v3877_v5 = vld [vmem:[%s4880_s2 + $0x180] ss:$8 sps:$4 sm:$0xff]  }
 0x1b3   : > { %v1155_v6 = vadd.f32 %v4320_v10, %v1124_v37  ;;  %v1125_v39 = vmax.f32 %v1096_v56, %v1097_v38  ;;  %1434 = vmatmul.mubr.bf16.gmra.mrb[28].mxu1 %v4453_v23  ;;  %v3879_v56 = vld [vmem:[%s4880_s2 + $0x184] ss:$8 sps:$4 sm:$0xff]   ;;  %v3882_v37 = vld [vmem:[%s4880_s2 + $0x194] ss:$8 sps:$4 sm:$0xff]   ;;  %v3880_v38 = vld [vmem:[%s4880_s2 + $0x190] ss:$8 sps:$4 sm:$0xff]  }
 0x1b4   : > { %1556 = vmatprep.mubr.bf16.mxu1 %v4891_v31 }
 0x1b5   : > { %v1156_v57 = vadd.f32 %v4320_v10, %v1125_v39  ;;  %v1039_v45 = vpop.f32.mrb[88].mxu0  ;;  %v1179_v59 = vmax.f32 %v1155_v6, 0.0  ;;  %v3885_v6 = vld [vmem:[%s4880_s2 + $0x1a4] ss:$8 sps:$4 sm:$0xff]   ;;  %v3883_v39 = vld [vmem:[%s4880_s2 + $0x1a0] ss:$8 sps:$4 sm:$0xff]  }
 0x1b6   : > { %v1098_v58 = vmax.f32 %v4301_v61, %v1039_v45  ;;  %v1041_v46 = vpop.f32.mrb[89].mxu0  ;;  %v3858_v61 = vld [vmem:[%s4880_s2 + $0x114] ss:$8 sps:$4 sm:$0xff]   ;;  %v3891_v45 = vld [vmem:[%s4880_s2 + $0x1c4] ss:$8 sps:$4 sm:$0xff]  }
 0x1b7   : > { %v1180_v47 = vmax.f32 %v1156_v57, 0.0  ;;  %v1099_v8 = vmax.f32 %v4303_v62, %v1041_v46  ;;  %v1043_v40 = vpop.f32.mrb[90].mxu0  ;;  %v3886_v57 = vld [vmem:[%s4880_s2 + $0x1b0] ss:$8 sps:$4 sm:$0xff]   ;;  %v3894_v46 = vld [vmem:[%s4880_s2 + $0x1d4] ss:$8 sps:$4 sm:$0xff]  }
 0x1b8   : > { %v1100_v60 = vmax.f32 %v4305_v63, %v1043_v40  ;;  %v1045_v11 = vpop.f32.mrb[91].mxu0  ;;  %v3856_v63 = vld [vmem:[%s4880_s2 + $0x110] ss:$8 sps:$4 sm:$0xff]   ;;  %v3900_v40 = vld [vmem:[%s4880_s2 + $0x1f4] ss:$8 sps:$4 sm:$0xff]  }
 0x1b9   : > { %v1126_v25 = vmax.f32 %v1098_v58, %v1099_v8  ;;  %v1101_v48 = vmax.f32 %v4307_v0, %v1045_v11  ;;  %v4470_v13 = vpack.c.bf16 %v1180_v47, %v1179_v59  ;;  %v3889_v58 = vld [vmem:[%s4880_s2 + $0x1c0] ss:$8 sps:$4 sm:$0xff]   ;;  %v3892_v59 = vld [vmem:[%s4880_s2 + $0x1d0] ss:$8 sps:$4 sm:$0xff]   ;;  %v3897_v47 = vld [vmem:[%s4880_s2 + $0x1e4] ss:$8 sps:$4 sm:$0xff]  }
 0x1ba   : > { %v3895_v8 = vld [vmem:[%s4880_s2 + $0x1e0] ss:$8 sps:$4 sm:$0xff]   ;;  %v3903_v11 = vld [vmem:[%s4880_s2 + $0x204] ss:$8 sps:$4 sm:$0xff]  }
 0x1bb   : > { %v1157_v15 = vadd.f32 %v4320_v10, %v1126_v25  ;;  %v1127_v62 = vmax.f32 %v1100_v60, %v1101_v48  ;;  %1557 = vmatmul.mubr.bf16.vlgmr.msra.gmra.mrb[0].mxu1 %v4327_v9  ;;  %v3898_v60 = vld [vmem:[%s4880_s2 + $0x1f0] ss:$8 sps:$4 sm:$0xff]   ;;  %v3982_v25 = vmov 0.0   ;;  %v3926_v48 = vld [vmem:[%s4883_s5 + $0x8] sm:$0xff]  }
 0x1bc   : > { %1743 = vmatpush1.bf16.msra.mxu1 %v3853_v12  ;;  %1566 = vmatprep.mubr.bf16.mxu1 %v4891_v31  ;;  %v3925_v12 = vld [vmem:[%s4883_s5] sm:$0xff]  }
 0x1bd   : > { %v1158_v0 = vadd.f32 %v4320_v10, %v1127_v62  ;;  %v1049_v26 = vpop.f32.mrb[92].mxu0  ;;  %1744 = vmatprep.subr.bf16.mxu1 %v3858_v61  ;;  %v1181_v19 = vmax.f32 %v1157_v15, 0.0  ;;  %3452 = vmatprep.subr.bf16.mxu0 %v3982_v25  ;;  %v3927_v61 = vld [vmem:[%s4883_s5 + $0x10] sm:$0xff]   ;;  %v3901_v15 = vld [vmem:[%s4880_s2 + $0x200] ss:$8 sps:$4 sm:$0xff]  }
 0x1be   : > { %v1102_v34 = vmax.f32 %v4309_v1, %v1049_v26  ;;  %v1051_v49 = vpop.f32.mrb[93].mxu0  ;;  %v3864_v1 = vld [vmem:[%s4880_s2 + $0x134] ss:$8 sps:$4 sm:$0xff]   ;;  %3453 = vmatpush3.bf16.msra.mxu0 %v3925_v12  ;;  %v3909_v26 = vld [vmem:[%s4880_s2 + $0x224] ss:$8 sps:$4 sm:$0xff]   ;;  %3468 = vmatprep.mubr.msk.bf16.mxu0 %vm3983_vm2, %v3982_v25 }
 0x1bf   : > { %v1182_v9 = vmax.f32 %v1158_v0, 0.0  ;;  %v1103_v50 = vmax.f32 %v4311_v2, %v1051_v49  ;;  %v1053_v36 = vpop.f32.mrb[94].mxu0  ;;  %3454 = vmatprep.subr.bf16.mxu0 %v3982_v25  ;;  %v3906_v62 = vld [vmem:[%s4880_s2 + $0x214] ss:$8 sps:$4 sm:$0xff]   ;;  %v3904_v0 = vld [vmem:[%s4880_s2 + $0x210] ss:$8 sps:$4 sm:$0xff]  }
 0x1c0   : > { %v1104_v51 = vmax.f32 %v4313_v3, %v1053_v36  ;;  %v1055_v27 = vpop.f32.mrb[95].mxu0  ;;  %1745 = vmatpush1.bf16.msra.mxu1 %v3856_v63  ;;  %v3862_v3 = vld [vmem:[%s4880_s2 + $0x130] ss:$8 sps:$4 sm:$0xff]   ;;  %v3930_v49 = vld [vmem:[%s4883_s5 + $0x28] sm:$0xff]  }
 0x1c1   : > { %v1128_v42 = vmax.f32 %v1102_v34, %v1103_v50  ;;  %v1105_v17 = vmax.f32 %v4892_v52, %v1055_v27  ;;  %1746 = vmatprep.subr.bf16.mxu1 %v3861_v33  ;;  %v4492_v28 = vpack.c.bf16 %v1182_v9, %v1181_v19  ;;  %v3928_v63 = vld [vmem:[%s4883_s5 + $0x18] sm:$0xff]   ;;  %v3929_v33 = vld [vmem:[%s4883_s5 + $0x20] sm:$0xff]   ;;  %v3931_v50 = vld [vmem:[%s4883_s5 + $0x30] sm:$0xff]  }
 0x1c2   : > { %3455 = vmatpush3.bf16.msra.mxu0 %v3926_v48  ;;  %v3912_v34 = vld [vmem:[%s4880_s2 + $0x234] ss:$8 sps:$4 sm:$0xff]   ;;  %v3910_v19 = vld [vmem:[%s4880_s2 + $0x230] ss:$8 sps:$4 sm:$0xff]   ;;  %v3915_v9 = vld [vmem:[%s4880_s2 + $0x244] ss:$8 sps:$4 sm:$0xff]  }
 0x1c3   : > { %v1159_v2 = vadd.f32 %v4320_v10, %v1128_v42  ;;  %v1129_v44 = vmax.f32 %v1104_v51, %v1105_v17  ;;  %1567 = vmatmul.mubr.bf16.gmra.mrb[4].mxu1 %v4339_v20  ;;  %v3865_v20 = vld [vmem:[%s4880_s2 + $0x140] ss:$8 sps:$4 sm:$0xff]   ;;  %3456 = vmatprep.subr.bf16.mxu0 %v3982_v25  ;;  %v3918_v51 = vld [vmem:[%s4880_s2 + $0x254] ss:$8 sps:$4 sm:$0xff]   ;;  %v3921_v42 = vld [vmem:[%s4880_s2 + $0x264] ss:$8 sps:$4 sm:$0xff]  }
 0x1c4   : > { %1576 = vmatprep.mubr.bf16.mxu1 %v4891_v31  ;;  %1747 = vmatpush1.bf16.msra.mxu1 %v3859_v41  ;;  %v3913_v36 = vld [vmem:[%s4880_s2 + $0x240] ss:$8 sps:$4 sm:$0xff]   ;;  %v3932_v27 = vld [vmem:[%s4883_s5 + $0x38] sm:$0xff]   ;;  %v3935_v12 = vld [vmem:[%s4883_s5 + $0x50] sm:$0xff]  }
 0x1c5   : > { %v1160_v18 = vadd.f32 %v4320_v10, %v1129_v44  ;;  %1748 = vmatprep.subr.bf16.mxu1 %v3864_v1  ;;  %v1183_v53 = vmax.f32 %v1159_v2, 0.0  ;;  %v3868_v10 = vld [vmem:[%s4880_s2 + $0x150] ss:$8 sps:$4 sm:$0xff]   ;;  %v3919_v52 = vld [vmem:[%s4880_s2 + $0x260] ss:$8 sps:$4 sm:$0xff]  }
 0x1c6   : > { %3457 = vmatpush3.bf16.msra.mxu0 %v3927_v61  ;;  %v3916_v41 = vld [vmem:[%s4880_s2 + $0x250] ss:$8 sps:$4 sm:$0xff]   ;;  %v3924_v17 = vld [vmem:[%s4880_s2 + $0x274] ss:$8 sps:$4 sm:$0xff]  }
 0x1c7   : > { %v1184_v29 = vmax.f32 %v1160_v18, 0.0  ;;  %3458 = vmatprep.subr.bf16.mxu0 %v3982_v25  ;;  %v3922_v1 = vld [vmem:[%s4880_s2 + $0x270] ss:$8 sps:$4 sm:$0xff]  }
 0x1c8   : > { %1749 = vmatpush1.bf16.msra.mxu1 %v3862_v3  ;;  %v3961_v3 = vld [vmem:[%s4885_s7 + $0x20] sm:$0xff]  }
 0x1c9   : > { %1750 = vmatprep.subr.bf16.mxu1 %v3867_v4  ;;  %v4510_v21 = vpack.c.bf16 %v1184_v29, %v1183_v53  ;;  %v3962_v4 = vld [vmem:[%s4885_s7 + $0x28] sm:$0xff]  }
 0x1ca   : > { %3459 = vmatpush3.bf16.msra.mxu0 %v3928_v63  ;;  %v3936_v63 = vld [vmem:[%s4883_s5 + $0x58] sm:$0xff]  }
 0x1cb   : > { %1577 = vmatmul.mubr.bf16.gmra.mrb[8].mxu1 %v4361_v16  ;;  %3460 = vmatprep.subr.bf16.mxu0 %v3982_v25 }
 0x1cc   : > { %1586 = vmatprep.mubr.bf16.mxu1 %v4891_v31  ;;  %1751 = vmatpush1.bf16.msra.mxu1 %v3865_v20 }
 0x1cd   : > { %1752 = vmatprep.subr.bf16.mxu1 %v3870_v54  ;;  %v4746_v54 = vld [vmem:[%s4882_s4] ss:$0 sm:$0xff] }
 0x1ce   : > { %3461 = vmatpush3.bf16.msra.mxu0 %v3929_v33 }
 0x1cf   : > { %3462 = vmatprep.subr.bf16.mxu0 %v3982_v25 }
 0x1d0   : > { %1753 = vmatpush1.bf16.msra.mxu1 %v3868_v10 }
 0x1d1   : > { %1754 = vmatprep.subr.bf16.mxu1 %v3873_v55 }
 0x1d2   : > { %3463 = vmatpush3.bf16.msra.mxu0 %v3930_v49 }
 0x1d3   : > { %1587 = vmatmul.mubr.bf16.gmra.mrb[12].mxu1 %v4382_v7  ;;  %3464 = vmatprep.subr.bf16.mxu0 %v3982_v25 }
 0x1d4   : > { %1596 = vmatprep.mubr.bf16.mxu1 %v4891_v31  ;;  %1755 = vmatpush1.bf16.msra.mxu1 %v3871_v30  ;;  %v3963_v30 = vld [vmem:[%s4885_s7 + $0x30] sm:$0xff]  }
 0x1d5   : > { %1756 = vmatprep.subr.bf16.mxu1 %v3876_v22 }
 0x1d6   : > { %3465 = vmatpush3.bf16.msra.mxu0 %v3931_v50  ;;  %v3937_v50 = vld [vmem:[%s4883_s5 + $0x60] sm:$0xff]  }
 0x1d7   : > { %3466 = vmatprep.subr.bf16.mxu0 %v3982_v25 }
 0x1d8   : > { %1757 = vmatpush1.bf16.msra.mxu1 %v3874_v32 }
 0x1d9   : > { %1992 = vmatprep.subr.bf16.mxu1 %v3879_v56 }
 0x1da   : > { %3467 = vmatpush3.bf16.msra.mxu0 %v3932_v27  ;;  %v3938_v27 = vld [vmem:[%s4883_s5 + $0x68] sm:$0xff]  }
 0x1db   : > { %1597 = vmatmul.mubr.bf16.gmra.mrb[16].mxu1 %v4404_v35  ;;  %3472 = vmatprep.subr.bf16.mxu0 %v3982_v25 }
 0x1dc   : > { %1606 = vmatprep.mubr.bf16.mxu1 %v4891_v31 }
 0x1e3   : > { %1607 = vmatmul.mubr.bf16.gmra.mrb[20].mxu1 %v4423_v24 }
 0x1e4   : > { %1616 = vmatprep.mubr.bf16.mxu1 %v4891_v31 }
 0x1eb   : > { %1617 = vmatmul.mubr.bf16.gmra.mrb[24].mxu1 %v4433_v14 }
 0x1ec   : > { %1626 = vmatprep.mubr.bf16.mxu1 %v4891_v31 }
 0x1f3   : > { %1627 = vmatmul.mubr.bf16.gmra.mrb[28].mxu1 %v4443_v43 }
 0x1f4   : > { %1774 = vmatprep.mubr.bf16.mxu1 %v4891_v31 }
 0x1fb   : > { %1775 = vmatmul.mubr.bf16.vlgmr.msra.gmra.mrb[0].mxu1 %v4361_v16  ;;  %v3888_v16 = vld [vmem:[%s4880_s2 + $0x1b4] ss:$8 sps:$4 sm:$0xff]  }
 0x1fc   : > { %1993 = vmatpush1.bf16.msra.mxu1 %v3877_v5  ;;  %1784 = vmatprep.mubr.bf16.mxu1 %v4891_v31 }
 0x1fd   : > { %1994 = vmatprep.subr.bf16.mxu1 %v3882_v37 }
 0x200   : > { %1995 = vmatpush1.bf16.msra.mxu1 %v3880_v38 }
 0x201   : > { %1996 = vmatprep.subr.bf16.mxu1 %v3885_v6 }
 0x203   : > { %1785 = vmatmul.mubr.bf16.gmra.mrb[4].mxu1 %v4382_v7 }
 0x204   : > { %1794 = vmatprep.mubr.bf16.mxu1 %v4891_v31  ;;  %1997 = vmatpush1.bf16.msra.mxu1 %v3883_v39 }
 0x205   : > { %1998 = vmatprep.subr.bf16.mxu1 %v3888_v16 }
 0x208   : > { %1999 = vmatpush1.bf16.msra.mxu1 %v3886_v57 }
 0x209   : > { %2000 = vmatprep.subr.bf16.mxu1 %v3891_v45  ;;  %v3933_v45 = vld [vmem:[%s4883_s5 + $0x40] sm:$0xff]  }
 0x20b   : > { %1795 = vmatmul.mubr.bf16.gmra.mrb[8].mxu1 %v4404_v35 }
 0x20c   : > { %1804 = vmatprep.mubr.bf16.mxu1 %v4891_v31  ;;  %2001 = vmatpush1.bf16.msra.mxu1 %v3889_v58 }
 0x20d   : > { %2002 = vmatprep.subr.bf16.mxu1 %v3894_v46 }
 0x210   : > { %2003 = vmatpush1.bf16.msra.mxu1 %v3892_v59  ;;  %v3934_v59 = vld [vmem:[%s4883_s5 + $0x48] sm:$0xff]  }
 0x211   : > { %2004 = vmatprep.subr.bf16.mxu1 %v3897_v47 }
 0x213   : > { %1805 = vmatmul.mubr.bf16.gmra.mrb[12].mxu1 %v4423_v24 }
 0x214   : > { %1814 = vmatprep.mubr.bf16.mxu1 %v4891_v31  ;;  %2005 = vmatpush1.bf16.msra.mxu1 %v3895_v8 }
 0x215   : > { %2006 = vmatprep.subr.bf16.mxu1 %v3900_v40 }
 0x218   : > { %2007 = vmatpush1.bf16.msra.mxu1 %v3898_v60 }
 0x219   : > { %2242 = vmatprep.subr.bf16.mxu1 %v3903_v11 }
 0x21b   : > { %1815 = vmatmul.mubr.bf16.gmra.mrb[16].mxu1 %v4433_v14 }
 0x21c   : > { %1824 = vmatprep.mubr.bf16.mxu1 %v4891_v31 }
 0x223   : > { %1825 = vmatmul.mubr.bf16.gmra.mrb[20].mxu1 %v4443_v43 }
 0x224   : > { %1834 = vmatprep.mubr.bf16.mxu1 %v4891_v31 }
 0x22b   : > { %1835 = vmatmul.mubr.bf16.gmra.mrb[24].mxu1 %v4453_v23 }
 0x22c   : > { %1844 = vmatprep.mubr.bf16.mxu1 %v4891_v31 }
 0x233   : > { %1845 = vmatmul.mubr.bf16.gmra.mrb[28].mxu1 %v4470_v13 }
 0x234   : > { %2024 = vmatprep.mubr.bf16.mxu1 %v4891_v31 }
 0x23b   : > { %2025 = vmatmul.mubr.bf16.vlgmr.msra.gmra.mrb[0].mxu1 %v4382_v7  ;;  %v3907_v7 = vld [vmem:[%s4880_s2 + $0x220] ss:$8 sps:$4 sm:$0xff]  }
 0x23c   : > { %2243 = vmatpush1.bf16.msra.mxu1 %v3901_v15  ;;  %2034 = vmatprep.mubr.bf16.mxu1 %v4891_v31 }
 0x23d   : > { %2244 = vmatprep.subr.bf16.mxu1 %v3906_v62 }
 0x240   : > { %2245 = vmatpush1.bf16.msra.mxu1 %v3904_v0 }
 0x241   : > { %2246 = vmatprep.subr.bf16.mxu1 %v3909_v26 }
 0x243   : > { %2035 = vmatmul.mubr.bf16.gmra.mrb[4].mxu1 %v4404_v35 }
 0x244   : > { %2044 = vmatprep.mubr.bf16.mxu1 %v4891_v31  ;;  %2247 = vmatpush1.bf16.msra.mxu1 %v3907_v7 }
 0x245   : > { %2248 = vmatprep.subr.bf16.mxu1 %v3912_v34 }
 0x248   : > { %2249 = vmatpush1.bf16.msra.mxu1 %v3910_v19 }
 0x249   : > { %2250 = vmatprep.subr.bf16.mxu1 %v3915_v9 }
 0x24b   : > { %2045 = vmatmul.mubr.bf16.gmra.mrb[8].mxu1 %v4423_v24 }
 0x24c   : > { %2054 = vmatprep.mubr.bf16.mxu1 %v4891_v31  ;;  %2251 = vmatpush1.bf16.msra.mxu1 %v3913_v36 }
 0x24d   : > { %2252 = vmatprep.subr.bf16.mxu1 %v3918_v51 }
 0x250   : > { %2253 = vmatpush1.bf16.msra.mxu1 %v3916_v41 }
 0x251   : > { %2254 = vmatprep.subr.bf16.mxu1 %v3921_v42 }
 0x253   : > { %2055 = vmatmul.mubr.bf16.gmra.mrb[12].mxu1 %v4433_v14 }
 0x254   : > { %2064 = vmatprep.mubr.bf16.mxu1 %v4891_v31  ;;  %2255 = vmatpush1.bf16.msra.mxu1 %v3919_v52 }
 0x255   : > { %2256 = vmatprep.subr.bf16.mxu1 %v3924_v17 }
 0x258   : > { %2257 = vmatpush1.bf16.msra.mxu1 %v3922_v1 }
 0x259   : > { %3532 = vmatprep.subr.bf16.mxu1 %v3982_v25 }
 0x25b   : > { %2065 = vmatmul.mubr.bf16.gmra.mrb[16].mxu1 %v4443_v43 }
 0x25c   : > { %2074 = vmatprep.mubr.bf16.mxu1 %v4891_v31 }
 0x263   : > { %2075 = vmatmul.mubr.bf16.gmra.mrb[20].mxu1 %v4453_v23 }
 0x264   : > { %2084 = vmatprep.mubr.bf16.mxu1 %v4891_v31 }
 0x26b   : > { %2085 = vmatmul.mubr.bf16.gmra.mrb[24].mxu1 %v4470_v13 }
 0x26c   : > { %2094 = vmatprep.mubr.bf16.mxu1 %v4891_v31 }
 0x273   : > { %2095 = vmatmul.mubr.bf16.gmra.mrb[28].mxu1 %v4492_v28 }
 0x274   : > { %2274 = vmatprep.mubr.bf16.mxu1 %v4891_v31 }
 0x27b   : > { %2275 = vmatmul.mubr.bf16.vlgmr.msra.gmra.mrb[0].mxu1 %v4404_v35  ;;  %v3957_v35 = vld [vmem:[%s4885_s7] sm:$0xff]  }
 0x27c   : > { %2284 = vmatprep.mubr.bf16.mxu1 %v4891_v31  ;;  %3533 = vmatpush3.bf16.msra.mxu1 %v3957_v35  ;;  %v3939_v35 = vld [vmem:[%s4883_s5 + $0x70] sm:$0xff]  }
 0x27d   : > { %3534 = vmatprep.subr.bf16.mxu1 %v3982_v25 }
 0x283   : > { %2285 = vmatmul.mubr.bf16.gmra.mrb[4].mxu1 %v4423_v24  ;;  %v3958_v24 = vld [vmem:[%s4885_s7 + $0x8] sm:$0xff]  }
 0x284   : > { %2294 = vmatprep.mubr.bf16.mxu1 %v4891_v31  ;;  %3535 = vmatpush3.bf16.msra.mxu1 %v3958_v24 }
 0x285   : > { %3536 = vmatprep.subr.bf16.mxu1 %v3982_v25 }
 0x28b   : > { %2295 = vmatmul.mubr.bf16.gmra.mrb[8].mxu1 %v4433_v14 }
 0x28c   : > { %2304 = vmatprep.mubr.bf16.mxu1 %v4891_v31 }
 0x293   : > { %2305 = vmatmul.mubr.bf16.gmra.mrb[12].mxu1 %v4443_v43  ;;  %v3960_v43 = vld [vmem:[%s4885_s7 + $0x18] sm:$0xff]  }
 0x294   : > { %2314 = vmatprep.mubr.bf16.mxu1 %v4891_v31 }
 0x29b   : > { %2315 = vmatmul.mubr.bf16.gmra.mrb[16].mxu1 %v4453_v23 }
 0x29c   : > { %2324 = vmatprep.mubr.bf16.mxu1 %v4891_v31 }
 0x2a3   : > { %2325 = vmatmul.mubr.bf16.gmra.mrb[20].mxu1 %v4470_v13 }
 0x2a4   : > { %2334 = vmatprep.mubr.bf16.mxu1 %v4891_v31 }
 0x2ab   : > { %2335 = vmatmul.mubr.bf16.gmra.mrb[24].mxu1 %v4492_v28 }
 0x2ac   : > { %2344 = vmatprep.mubr.bf16.mxu1 %v4891_v31  ;;  %v3959_v31 = vld [vmem:[%s4885_s7 + $0x10] sm:$0xff]  }
 0x2ad   : > { %3537 = vmatpush3.bf16.msra.mxu1 %v3959_v31 }
 0x2ae   : > { %3538 = vmatprep.subr.bf16.mxu1 %v3982_v25 }
 0x2b1   : > { %3539 = vmatpush3.bf16.msra.mxu1 %v3960_v43 }
 0x2b2   : > { %3540 = vmatprep.subr.bf16.mxu1 %v3982_v25 }
 0x2b3   : > { %2345 = vmatmul.mubr.bf16.gmra.mrb[28].mxu1 %v4510_v21 }
 0x2b4   : > { %3548 = vmatprep.mubr.msk.bf16.mxu1 %vm3983_vm2, %v3982_v25 }
 0x2b5   : > { %3541 = vmatpush3.bf16.msra.mxu1 %v3961_v3 }
 0x2b6   : > { %3542 = vmatprep.subr.bf16.mxu1 %v3982_v25 }
 0x2b9   : > { %3543 = vmatpush3.bf16.msra.mxu1 %v3962_v4 }
 0x2ba   : > { %3544 = vmatprep.subr.bf16.mxu1 %v3982_v25 }
 0x2bd   : > { %3545 = vmatpush3.bf16.msra.mxu1 %v3963_v30 }
 0x2be   : > { %3546 = vmatprep.subr.bf16.mxu1 %v3982_v25 }
 0x34e   : > { %v2276_v14 = vpop.f32.mrb[0].mxu1 }
 0x34f   : > { %v2278_v23 = vpop.f32.mrb[1].mxu1 }
 0x350   : > { %v2387_v13 = vmax.f32 %v2276_v14, %v2278_v23  ;;  %v2280_v28 = vpop.f32.mrb[2].mxu1  ;;  %v3940_v23 = vld [vmem:[%s4883_s5 + $0x78] sm:$0xff]  }
 0x351   : > { %v2282_v2 = vpop.f32.mrb[3].mxu1 }
 0x352   : > { %v2388_v44 = vmax.f32 %v2280_v28, %v2282_v2 }
 0x356   : > { %v2286_v18 = vpop.f32.mrb[4].mxu1 }
 0x357   : > { %v2288_v53 = vpop.f32.mrb[5].mxu1 }
 0x358   : > { %v2389_v29 = vmax.f32 %v2286_v18, %v2288_v53  ;;  %v2290_v20 = vpop.f32.mrb[6].mxu1 }
 0x359   : > { %v2292_v21 = vpop.f32.mrb[7].mxu1 }
 0x35a   : > { %v2411_v10 = vmax.f32 %v2387_v13, %v2389_v29  ;;  %v2390_v55 = vmax.f32 %v2290_v20, %v2292_v21  ;;  %v3941_v29 = vld [vmem:[%s4883_s5 + $0x80] sm:$0xff]  }
 0x35c   : > { %v2420_v22 = vadd.f32 %v4746_v54, %v2411_v10  ;;  %v2412_v32 = vmax.f32 %v2388_v44, %v2390_v55  ;;  %v3942_v10 = vld [vmem:[%s4883_s5 + $0x88] sm:$0xff]  }
 0x35e   : > { %v2421_v56 = vadd.f32 %v4746_v54, %v2412_v32  ;;  %v2296_v5 = vpop.f32.mrb[8].mxu1  ;;  %v2422_v38 = vmax.f32 %v2420_v22, 0.0 }
 0x35f   : > { %v2298_v37 = vpop.f32.mrb[9].mxu1 }
 0x360   : > { %v2423_v6 = vmax.f32 %v2421_v56, 0.0  ;;  %v2391_v39 = vmax.f32 %v2296_v5, %v2298_v37  ;;  %v2300_v16 = vpop.f32.mrb[10].mxu1  ;;  %v3943_v5 = vld [vmem:[%s4883_s5 + $0x90] sm:$0xff]  }
 0x361   : > { %v2302_v57 = vpop.f32.mrb[11].mxu1 }
 0x362   : > { %v2424_v58 = vpack.c.bf16 %v2423_v6, %v2422_v38  ;;  %v2392_v46 = vmax.f32 %v2300_v16, %v2302_v57  ;;  %v3944_v16 = vld [vmem:[%s4883_s5 + $0x98] sm:$0xff]  }
 0x364   : > { %3469 = vmatmul.mubr.bf16.vlgmr.msra.gmra.mrb[96].mxu0 %v2424_v58 }
 0x365   : > { %3473 = vmatpush3.bf16.msra.mxu0 %v3933_v45  ;;  %3488 = vmatprep.mubr.msk.bf16.mxu0 %vm3983_vm2, %v3982_v25 }
 0x366   : > { %v2306_v47 = vpop.f32.mrb[12].mxu1  ;;  %3474 = vmatprep.subr.bf16.mxu0 %v3982_v25 }
 0x367   : > { %v2308_v8 = vpop.f32.mrb[13].mxu1 }
 0x368   : > { %v2393_v40 = vmax.f32 %v2306_v47, %v2308_v8  ;;  %v2310_v60 = vpop.f32.mrb[14].mxu1  ;;  %v3946_v47 = vld [vmem:[%s4883_s5 + $0xa8] sm:$0xff]   ;;  %v3948_v8 = vld [vmem:[%s4883_s5 + $0xb8] sm:$0xff]  }
 0x369   : > { %3475 = vmatpush3.bf16.msra.mxu0 %v3934_v59  ;;  %v2312_v11 = vpop.f32.mrb[15].mxu1 }
 0x36a   : > { %v2532_v48 = vmax.f32 %v2391_v39, %v2393_v40  ;;  %v2394_v61 = vmax.f32 %v2310_v60, %v2312_v11  ;;  %3476 = vmatprep.subr.bf16.mxu0 %v3982_v25  ;;  %v3949_v40 = vld [vmem:[%s4883_s5 + $0xc0] sm:$0xff]   ;;  %v3950_v60 = vld [vmem:[%s4883_s5 + $0xc8] sm:$0xff]   ;;  %v3951_v11 = vld [vmem:[%s4883_s5 + $0xd0] sm:$0xff]  }
 0x36c   : > { %v2534_v15 = vadd.f32 %v4746_v54, %v2532_v48  ;;  %v2533_v62 = vmax.f32 %v2392_v46, %v2394_v61  ;;  %v3945_v46 = vld [vmem:[%s4883_s5 + $0xa0] sm:$0xff]   ;;  %v3954_v61 = vld [vmem:[%s4883_s5 + $0xe8] sm:$0xff]  }
 0x36d   : > { %3477 = vmatpush3.bf16.msra.mxu0 %v3935_v12  ;;  %v3952_v12 = vld [vmem:[%s4883_s5 + $0xd8] sm:$0xff]   ;;  %v3953_v48 = vld [vmem:[%s4883_s5 + $0xe0] sm:$0xff]  }
 0x36e   : > { %v2535_v0 = vadd.f32 %v4746_v54, %v2533_v62  ;;  %v2316_v26 = vpop.f32.mrb[16].mxu1  ;;  %3478 = vmatprep.subr.bf16.mxu0 %v3982_v25  ;;  %v2536_v7 = vmax.f32 %v2534_v15, 0.0  ;;  %v3955_v15 = vld [vmem:[%s4883_s5 + $0xf0] sm:$0xff]   ;;  %v3956_v62 = vld [vmem:[%s4883_s5 + $0xf8] sm:$0xff]  }
 0x36f   : > { %v2318_v33 = vpop.f32.mrb[17].mxu1 }
 0x370   : > { %v2537_v34 = vmax.f32 %v2535_v0, 0.0  ;;  %v2395_v49 = vmax.f32 %v2316_v26, %v2318_v33  ;;  %v2320_v19 = vpop.f32.mrb[18].mxu1  ;;  %v3314_v0 = vld [vmem:[%s4884_s6] ss:$0 sm:$0xff] }
 0x371   : > { %3479 = vmatpush3.bf16.msra.mxu0 %v3936_v63  ;;  %v2322_v9 = vpop.f32.mrb[19].mxu1  ;;  %v3964_v63 = vld [vmem:[%s4885_s7 + $0x38] sm:$0xff]  }
 0x372   : > { %v2538_v36 = vpack.c.bf16 %v2537_v34, %v2536_v7  ;;  %v2396_v51 = vmax.f32 %v2320_v19, %v2322_v9  ;;  %3480 = vmatprep.subr.bf16.mxu0 %v3982_v25  ;;  %3547 = vmatpush3.bf16.msra.mxu1 %v3964_v63 }
 0x375   : > { %3481 = vmatpush3.bf16.msra.mxu0 %v3937_v50 }
 0x376   : > { %v2326_v41 = vpop.f32.mrb[20].mxu1  ;;  %3482 = vmatprep.subr.bf16.mxu0 %v3982_v25 }
 0x377   : > { %v2328_v42 = vpop.f32.mrb[21].mxu1 }
 0x378   : > { %v2397_v52 = vmax.f32 %v2326_v41, %v2328_v42  ;;  %v2330_v17 = vpop.f32.mrb[22].mxu1 }
 0x379   : > { %3483 = vmatpush3.bf16.msra.mxu0 %v3938_v27  ;;  %v2332_v1 = vpop.f32.mrb[23].mxu1 }
 0x37a   : > { %v2647_v24 = vmax.f32 %v2395_v49, %v2397_v52  ;;  %v2398_v31 = vmax.f32 %v2330_v17, %v2332_v1  ;;  %3484 = vmatprep.subr.bf16.mxu0 %v3982_v25 }
 0x37c   : > { %v2649_v14 = vadd.f32 %v4746_v54, %v2647_v24  ;;  %v2648_v43 = vmax.f32 %v2396_v51, %v2398_v31 }
 0x37d   : > { %3485 = vmatpush3.bf16.msra.mxu0 %v3939_v35 }
 0x37e   : > { %v2650_v13 = vadd.f32 %v4746_v54, %v2648_v43  ;;  %v2336_v28 = vpop.f32.mrb[24].mxu1  ;;  %3486 = vmatprep.subr.bf16.mxu0 %v3982_v25  ;;  %v2651_v44 = vmax.f32 %v2649_v14, 0.0 }
 0x37f   : > { %v2338_v2 = vpop.f32.mrb[25].mxu1 }
 0x380   : > { %v2652_v3 = vmax.f32 %v2650_v13, 0.0  ;;  %v2399_v18 = vmax.f32 %v2336_v28, %v2338_v2  ;;  %v2340_v4 = vpop.f32.mrb[26].mxu1 }
 0x381   : > { %3487 = vmatpush3.bf16.msra.mxu0 %v3940_v23  ;;  %v2342_v53 = vpop.f32.mrb[27].mxu1 }
 0x382   : > { %v2653_v20 = vpack.c.bf16 %v2652_v3, %v2651_v44  ;;  %v2400_v21 = vmax.f32 %v2340_v4, %v2342_v53  ;;  %3492 = vmatprep.subr.bf16.mxu0 %v3982_v25 }
 0x384   : > { %3489 = vmatmul.mubr.bf16.vlgmr.msra.gmra.mrb[96].mxu0 %v2538_v36  ;;  %v3396_v36 = vld [vmem:[%s4886_s8] ss:$0 sm:$0xff] }
 0x385   : > { %3493 = vmatpush3.bf16.msra.mxu0 %v3941_v29  ;;  %3508 = vmatprep.mubr.msk.bf16.mxu0 %vm3983_vm2, %v3982_v25 }
 0x386   : > { %v2346_v55 = vpop.f32.mrb[28].mxu1  ;;  %3494 = vmatprep.subr.bf16.mxu0 %v3982_v25 }
 0x387   : > { %v2348_v30 = vpop.f32.mrb[29].mxu1 }
 0x388   : > { %v2401_v22 = vmax.f32 %v2346_v55, %v2348_v30  ;;  %v2350_v32 = vpop.f32.mrb[30].mxu1 }
 0x389   : > { %3495 = vmatpush3.bf16.msra.mxu0 %v3942_v10  ;;  %v2352_v56 = vpop.f32.mrb[31].mxu1 }
 0x38a   : > { %v2762_v37 = vmax.f32 %v2399_v18, %v2401_v22  ;;  %v2402_v38 = vmax.f32 %v2350_v32, %v2352_v56  ;;  %3496 = vmatprep.subr.bf16.mxu0 %v3982_v25 }
 0x38c   : > { %v2764_v6 = vadd.f32 %v4746_v54, %v2762_v37  ;;  %v2763_v39 = vmax.f32 %v2400_v21, %v2402_v38 }
 0x38d   : > { %3497 = vmatpush3.bf16.msra.mxu0 %v3943_v5 }
 0x38e   : > { %v2765_v57 = vadd.f32 %v4746_v54, %v2763_v39  ;;  %3498 = vmatprep.subr.bf16.mxu0 %v3982_v25  ;;  %v2766_v45 = vmax.f32 %v2764_v6, 0.0  ;;  %v3947_v54 = vld [vmem:[%s4883_s5 + $0xb0] sm:$0xff]  }
 0x390   : > { %v2767_v58 = vmax.f32 %v2765_v57, 0.0 }
 0x391   : > { %3499 = vmatpush3.bf16.msra.mxu0 %v3944_v16 }
 0x392   : > { %v2768_v59 = vpack.c.bf16 %v2767_v58, %v2766_v45  ;;  %3500 = vmatprep.subr.bf16.mxu0 %v3982_v25 }
 0x395   : > { %3501 = vmatpush3.bf16.msra.mxu0 %v3945_v46 }
 0x396   : > { %3502 = vmatprep.subr.bf16.mxu0 %v3982_v25 }
 0x399   : > { %3503 = vmatpush3.bf16.msra.mxu0 %v3946_v47 }
 0x39a   : > { %3504 = vmatprep.subr.bf16.mxu0 %v3982_v25 }
 0x39d   : > { %3505 = vmatpush3.bf16.msra.mxu0 %v3947_v54 }
 0x39e   : > { %3506 = vmatprep.subr.bf16.mxu0 %v3982_v25 }
 0x3a1   : > { %3507 = vmatpush3.bf16.msra.mxu0 %v3948_v8 }
 0x3a2   : > { %3512 = vmatprep.subr.bf16.mxu0 %v3982_v25 }
 0x3a4   : > { %3509 = vmatmul.mubr.bf16.vlgmr.msra.gmra.mrb[96].mxu0 %v2653_v20 }
 0x3a5   : > { %3513 = vmatpush3.bf16.msra.mxu0 %v3949_v40  ;;  %3528 = vmatprep.mubr.msk.bf16.mxu0 %vm3983_vm2, %v3982_v25 }
 0x3a6   : > { %3514 = vmatprep.subr.bf16.mxu0 %v3982_v25 }
 0x3a9   : > { %3515 = vmatpush3.bf16.msra.mxu0 %v3950_v60 }
 0x3aa   : > { %3516 = vmatprep.subr.bf16.mxu0 %v3982_v25 }
 0x3ad   : > { %3517 = vmatpush3.bf16.msra.mxu0 %v3951_v11 }
 0x3ae   : > { %3518 = vmatprep.subr.bf16.mxu0 %v3982_v25 }
 0x3b1   : > { %3519 = vmatpush3.bf16.msra.mxu0 %v3952_v12 }
 0x3b2   : > { %3520 = vmatprep.subr.bf16.mxu0 %v3982_v25 }
 0x3b5   : > { %3521 = vmatpush3.bf16.msra.mxu0 %v3953_v48 }
 0x3b6   : > { %3522 = vmatprep.subr.bf16.mxu0 %v3982_v25 }
 0x3b9   : > { %3523 = vmatpush3.bf16.msra.mxu0 %v3954_v61 }
 0x3ba   : > { %3524 = vmatprep.subr.bf16.mxu0 %v3982_v25 }
 0x3bd   : > { %3525 = vmatpush3.bf16.msra.mxu0 %v3955_v15 }
 0x3be   : > { %3526 = vmatprep.subr.bf16.mxu0 %v3982_v25 }
 0x3c1   : > { %3527 = vmatpush3.bf16.msra.mxu0 %v3956_v62 }
 0x3c4   : > { %3529 = vmatmul.mubr.bf16.vlgmr.msra.gmra.mrb[96].mxu0 %v2768_v59 }
 0x497   : > { %v2868_v26 = vpop.f32.mrb[96].mxu0 }
 0x498   : > { %v3552_v33 = vadd.f32 %v3314_v0, %v2868_v26  ;;  %v3530_v7 = vpop.f32.mrb[97].mxu0 }
 0x499   : > { %v2871_v34 = vpop.f32.mrb[98].mxu0 }
 0x49a   : > { %v3553_v49 = vadd.f32 %v3314_v0, %v2871_v34  ;;  %v3531_v19 = vpop.f32.mrb[99].mxu0  ;;  %v2877_v9 = vmax.f32 %v3552_v33, 0.0 }
 0x49c   : > { %v2878_v50 = vmax.f32 %v3553_v49, 0.0 }
 0x49e   : > { %v2879_v25 = vpack.c.bf16 %v2878_v50, %v2877_v9 }
 0x4a0   : > { %3549 = vmatmul.mubr.bf16.vlgmr.msra.gmra.mrb[32].mxu1 %v2879_v25 }
 0x573   : > { %v2985_v51 = vpop.f32.mrb[32].mxu1 }
 0x574   : > { %v2986_v27 = vadd.f32 %v3396_v36, %v2985_v51  ;;  %v3550_v41 = vpop.f32.mrb[33].mxu1 }
 0x575   : > { %v2988_v42 = vpop.f32.mrb[34].mxu1 }
 0x576   : > { %2992 = vmax.xlane.f32.xlu0 %v2986_v27  ;;  %v3551_v52 = vpop.f32.mrb[35].mxu1  ;;  %v2989_v17 = vadd.f32 %v3396_v36, %v2988_v42 }
 0x57a   : > { %2994 = vmax.xlane.f32.xlu0 %v2989_v17 }
 0x603   : > { %v2993_v1 = vpop.xlane.xlu0 %2992 }
 0x604   : > { %v2996_v35 = vsub.f32 %v2986_v27, %v2993_v1 }
 0x606   : > { %v2998_v24 = vmul.f32 1.442695, %v2996_v35 }
 0x607   : > { %v2995_v31 = vpop.xlane.xlu0 %2994 }
 0x608   : > { %v2997_v14 = vsub.f32 %v2989_v17, %v2995_v31  ;;  %3965 = vpow2.f32 %v2998_v24 }
 0x60a   : > { %v3000_v43 = vmul.f32 1.442695, %v2997_v14 }
 0x60c   : > { %3967 = vpow2.f32 %v3000_v43 }
 0x612   : > { %v3966_v23 = vpop.eup %3965 }
 0x613   : > { %3002 = vadd.xlane.f32.xlu1 %v3966_v23 }
 0x616   : > { %v3968_v13 = vpop.eup %3967 }
 0x617   : > { %3004 = vadd.xlane.f32.xlu1 %v3968_v13 }
 0x6a0   : > { %v3003_v28 = vpop.xlane.xlu1 %3002 }
 0x6a1   : > { %3969 = vlog2.f32 %v3003_v28 }
 0x6a4   : > { %v3005_v2 = vpop.xlane.xlu1 %3004 }
 0x6a5   : > { %3971 = vlog2.f32 %v3005_v2 }
 0x6ab   : > { %v3970_v44 = vpop.eup %3969 }
 0x6ac   : > { %v3007_v3 = vmul.f32 0.6931472, %v3970_v44 }
 0x6ae   : > { %v3010_v18 = vsub.f32 %v2996_v35, %v3007_v3 }
 0x6af   : > { %v3972_v4 = vpop.eup %3971 }
 0x6b0   : > { %3012 = vst [vmem:[%s332_s20] sm:$0xff] %v3010_v18  ;;  %v3009_v53 = vmul.f32 0.6931472, %v3972_v4 }
 0x6b2   : > { %v3011_v29 = vsub.f32 %v2997_v14, %v3009_v53 }
 0x6b4   : > { %3013 = vst [vmem:[%s332_s20 + $0x8] sm:$0xff] %v3011_v29 }
 0x6b5 PF: > { %s19_s30 = sadd.s32 1, %s3979_s30  }
 0x6b6   : > { %p16_p5 = scmp.ge.s32.totalorder %s19_s30, 4  }
 0x6b8   :  { %18 = sbr.rel (!%p16_p5) target bundleno = 1 (0x1), region = 93 }

</bundles_post_ra>
